<compile_context>
chip_gen: v5e
topology: v5e:2x2
jax: 0.10.0
libtpu: 0.0.40
codegen_flags: <defaults>
</compile_context>

<pallas_src>
import math
import functools

import jax
import jax.numpy as jnp
from jax.experimental import pallas as pl
from jax.experimental.pallas import tpu as pltpu


_LANE = 128
_SUBLANE = 8
_VMEM_LIMIT = 32 * 1024 * 1024   # safe on v5e/v6e (128 MiB) and v7x (64 MiB)


# ----------------------------------------------------------------------------
# small helpers
# ----------------------------------------------------------------------------

def _round_up(x, m):
    return (x + m - 1) // m * m


def _pad_to(x, shape):
    pads = [(0, t - s) for s, t in zip(x.shape, shape)]
    if any(hi for _, hi in pads):
        x = jnp.pad(x, pads)
    return x


def _gelu(x):
    # TODO(synk): PyTorch nn.GELU() default is the exact erf form; switch to
    # erf once it is guaranteed to lower in Mosaic (tanh approx, ~1e-3 drift).
    c = math.sqrt(2.0 / math.pi)
    return 0.5 * x * (1.0 + jnp.tanh(c * (x + 0.044715 * x * x * x)))


def _apply_act(x, act):
    if act == "gelu":
        return _gelu(x)
    if act == "gelu_sigmoid":
        # Reference model: decoder ends with ConvT -> GELU -> Dropout and
        # decode() applies sigmoid on top, so sigmoid(GELU(.)) is correct.
        return jax.nn.sigmoid(_gelu(x))
    return x


# ----------------------------------------------------------------------------
# Pallas kernel 1: batched tiled matmul + bias + activation (conv hot path)
# ----------------------------------------------------------------------------

def _bmm_bias_act_kernel(a_ref, b_ref, bias_ref, o_ref, acc_ref, *, act):
    k = pl.program_id(2)

    @pl.when(k == 0)
    def _():
        acc_ref[...] = jnp.zeros_like(acc_ref)

    acc_ref[...] += jnp.dot(a_ref[...], b_ref[...],
                            preferred_element_type=jnp.float32)

    @pl.when(k == pl.num_programs(2) - 1)
    def _():
        out = acc_ref[...] + bias_ref[...]          # (Mo,1) broadcasts over tn
        o_ref[...] = _apply_act(out, act).astype(o_ref.dtype)


def bmm_bias_act(a, b, bias, act="none", tn_max=512):
    """Batched (G, Mo, K) @ (G, K, Nn) + bias (G, Mo, 1), fused activation.

    Nn (the big spatial dim) sits on the lane axis so output stores are
    lane-dense.  MXU operands go in bf16; accumulation / bias / activation
    stay in f32.
    """
    G, Mo, K = a.shape
    _, _, Nn = b.shape

    # K padded for bf16 sublane packing; single reduction step unless K large.
    if K <= 2048:
        k_pad = _round_up(K, 16)
        tk = k_pad
    else:
        k_pad = _round_up(K, 512)
        tk = 512
    nk = k_pad // tk

    mo_pad = _round_up(Mo, _SUBLANE)
    tn = tn_max if Nn >= tn_max else _round_up(Nn, _LANE)
    nn_pad = _round_up(Nn, tn)

    a_p = _pad_to(a, (G, mo_pad, k_pad)).astype(jnp.bfloat16)
    b_p = _pad_to(b, (G, k_pad, nn_pad)).astype(jnp.bfloat16)
    bias_p = _pad_to(bias.astype(jnp.float32), (G, mo_pad, 1))

    out = pl.pallas_call(
        functools.partial(_bmm_bias_act_kernel, act=act),
        out_shape=jax.ShapeDtypeStruct((G, mo_pad, nn_pad), jnp.float32),
        grid=(G, nn_pad // tn, nk),
        in_specs=[
            pl.BlockSpec((None, mo_pad, tk), lambda g, n, k: (g, 0, k)),
            pl.BlockSpec((None, tk, tn), lambda g, n, k: (g, k, n)),
            pl.BlockSpec((None, mo_pad, 1), lambda g, n, k: (g, 0, 0)),
        ],
        out_specs=pl.BlockSpec((None, mo_pad, tn), lambda g, n, k: (g, 0, n)),
        scratch_shapes=[pltpu.VMEM((mo_pad, tn), jnp.float32)],
        compiler_params=pltpu.CompilerParams(
            dimension_semantics=("parallel", "parallel", "arbitrary"),
            vmem_limit_bytes=_VMEM_LIMIT),
    )(a_p, b_p, bias_p)
    return out[:, :Mo, :Nn]


# ----------------------------------------------------------------------------
# Pallas kernel 2: fused mu/logvar projection + reparameterize + decoder Linear
# ----------------------------------------------------------------------------

def _latent_kernel(h_ref, wml_ref, bml_ref, eps_ref, wd_ref, bd_ref,
                   muvar_ref, hdec_ref, *, zpad):
    muvar = jnp.dot(h_ref[...], wml_ref[...],
                    preferred_element_type=jnp.float32) + bml_ref[...]
    mu = muvar[:, :zpad]                 # lane-tile aligned split
    logvar = muvar[:, zpad:]
    z = mu + eps_ref[...] * jnp.exp(0.5 * logvar)
    hdec = jnp.dot(z.astype(wd_ref.dtype), wd_ref[...],
                   preferred_element_type=jnp.float32) + bd_ref[...]
    muvar_ref[...] = muvar
    hdec_ref[...] = hdec


def latent_fused(h_flat, w_mu, b_mu, w_logvar, b_logvar, eps, w_dec, b_dec):
    """One pallas_call:  [mu | logvar] = h @ W_ml + b ;
    z = mu + eps * exp(0.5 * logvar) ;  h_dec = z @ W_dec + b_dec."""
    B, hidden = h_flat.shape
    num_z = w_mu.shape[1]
    zpad = _round_up(num_z, _LANE)       # mu cols [0,zpad), logvar [zpad,2zpad)

    w_ml = jnp.zeros((hidden, 2 * zpad), jnp.float32)
    w_ml = w_ml.at[:, :num_z].set(w_mu).at[:, zpad:zpad + num_z].set(w_logvar)
    b_ml = jnp.zeros((1, 2 * zpad), jnp.float32)
    b_ml = b_ml.at[:, :num_z].set(b_mu).at[:, zpad:zpad + num_z].set(b_logvar)
    eps_p = jnp.zeros((B, zpad), jnp.float32).at[:, :num_z].set(eps)
    w_d = jnp.zeros((zpad, w_dec.shape[1]), jnp.float32).at[:num_z].set(w_dec)
    b_d = b_dec.reshape(1, -1).astype(jnp.float32)

    muvar, hdec = pl.pallas_call(
        functools.partial(_latent_kernel, zpad=zpad),
        out_shape=(jax.ShapeDtypeStruct((B, 2 * zpad), jnp.float32),
                   jax.ShapeDtypeStruct((B, hidden), jnp.float32)),
        grid=(1,),
        in_specs=[
            pl.BlockSpec((B, hidden), lambda i: (0, 0)),
            pl.BlockSpec((hidden, 2 * zpad), lambda i: (0, 0)),
            pl.BlockSpec((1, 2 * zpad), lambda i: (0, 0)),
            pl.BlockSpec((B, zpad), lambda i: (0, 0)),
            pl.BlockSpec((zpad, hidden), lambda i: (0, 0)),
            pl.BlockSpec((1, hidden), lambda i: (0, 0)),
        ],
        out_specs=(pl.BlockSpec((B, 2 * zpad), lambda i: (0, 0)),
                   pl.BlockSpec((B, hidden), lambda i: (0, 0))),
        compiler_params=pltpu.CompilerParams(
            dimension_semantics=("arbitrary",),
            vmem_limit_bytes=_VMEM_LIMIT),
    )(h_flat.astype(jnp.bfloat16), w_ml.astype(jnp.bfloat16), b_ml,
      eps_p, w_d.astype(jnp.bfloat16), b_d)

    return muvar[:, :num_z], muvar[:, zpad:zpad + num_z], hdec


# ----------------------------------------------------------------------------
# Conv layers in internal (C, N, H, W) layout (plain-JAX patch glue)
# ----------------------------------------------------------------------------

def conv2d_cnhw(x, weight, bias, stride, padding, act):
    # x: (C_in, N, H, W); weight: (C_out, C_in, k, k) (PyTorch Conv2d layout)
    C_out, C_in, k, _ = weight.shape
    _, N, H, W = x.shape
    H_out = (H + 2 * padding - k) // stride + 1
    W_out = (W + 2 * padding - k) // stride + 1
    xp = jnp.pad(x, ((0, 0), (0, 0), (padding, padding), (padding, padding)))
    cols = []
    for kh in range(k):
        for kw in range(k):
            cols.append(xp[:, :,
                           kh:kh + stride * H_out:stride,
                           kw:kw + stride * W_out:stride])
    patches = jnp.stack(cols, axis=1).reshape(C_in * k * k, N * H_out * W_out)
    a = weight.reshape(C_out, C_in * k * k)[None]       # (1, C_out, K)
    b = patches[None]                                   # (1, K, M)
    out = bmm_bias_act(a, b, bias[None, :, None], act=act)   # (1, C_out, M)
    return out[0].reshape(C_out, N, H_out, W_out)


def conv_transpose2d_cnhw(x, weight, bias, act):
    # ConvTranspose2d, stride=2, kernel=4, padding=1, via stride^2 sub-kernel
    # (sub-pixel) decomposition: 4 parity 2x2 convs over the un-dilated input.
    # x: (C_in, N, H, W); weight: (C_in, C_out, 4, 4) (PyTorch ConvT layout)
    C_in, C_out, k, _ = weight.shape
    assert k == 4, "sub-kernel decomposition specialized for k=4, s=2, p=1"
    _, N, H, W = x.shape
    # equivalent-conv weight: wf[co, ci, a, b] = weight[ci, co, 3-a, 3-b]
    wf = jnp.flip(weight, axis=(2, 3)).transpose(1, 0, 2, 3)

    a_list, b_list = [], []
    for r in (0, 1):
        for s in (0, 1):
            w_rs = wf[:, :, r::2, s::2]                 # taps kh=2*dh+r, kw=2*dw+s
            a_list.append(w_rs.reshape(C_out, C_in * 4))
            xp = jnp.pad(x, ((0, 0), (0, 0), (1 - r, r), (1 - s, s)))
            cols = [xp[:, :, dh:dh + H, dw:dw + W]
                    for dh in (0, 1) for dw in (0, 1)]
            b_list.append(jnp.stack(cols, axis=1).reshape(C_in * 4, N * H * W))

    a = jnp.stack(a_list)                               # (4, C_out, C_in*4)
    b = jnp.stack(b_list)                               # (4, C_in*4, N*H*W)
    bias4 = jnp.broadcast_to(bias[None, :, None], (4, C_out, 1))
    out = bmm_bias_act(a, b, bias4, act=act)            # (4, C_out, N*H*W)

    y = out.reshape(2, 2, C_out, N, H, W)               # (r, s, co, n, i, j)
    y = y.transpose(2, 3, 4, 0, 5, 1)                   # (co, n, i, r, j, s)
    return y.reshape(C_out, N, 2 * H, 2 * W)


# ----------------------------------------------------------------------------
# VAE: parameter construction + forward
# ----------------------------------------------------------------------------

def make_vae_params(key, input_dim, channels, num_z):
    height, width, _ = input_dim
    k, pad, stride, dil = 3, 1, 2, 1
    eh, ew = height, width
    for _ in range(len(channels) - 1):
        eh = int((eh + 2 * pad - dil * (k - 1) - 1) / stride + 1)
        ew = int((ew + 2 * pad - dil * (k - 1) - 1) / stride + 1)
    hidden = channels[-1] * eh * ew

    def init(key, shape, fan_in):
        return jax.random.normal(key, shape, jnp.float32) / math.sqrt(fan_in)

    keys = jax.random.split(key, 4 * len(channels) + 8)
    ki = iter(keys)
    params = {"enc": [], "dec": []}
    for i in range(len(channels) - 1):
        w = init(next(ki), (channels[i + 1], channels[i], 3, 3), channels[i] * 9)
        b = init(next(ki), (channels[i + 1],), channels[i] * 9)
        params["enc"].append((w, b))
    params["z_mu_w"] = init(next(ki), (hidden, num_z), hidden)
    params["z_mu_b"] = init(next(ki), (num_z,), hidden)
    params["z_logvar_w"] = init(next(ki), (hidden, num_z), hidden)
    params["z_logvar_b"] = init(next(ki), (num_z,), hidden)
    params["dec_lin_w"] = init(next(ki), (num_z, hidden), num_z)
    params["dec_lin_b"] = init(next(ki), (hidden,), num_z)
    for i in range(len(channels) - 1, 0, -1):
        w = init(next(ki), (channels[i], channels[i - 1], 4, 4), channels[i] * 16)
        b = init(next(ki), (channels[i - 1],), channels[i] * 16)
        params["dec"].append((w, b))
    cfg = {"eh": eh, "ew": ew, "channels": tuple(channels), "num_z": num_z}
    return params, cfg


def vae_forward(cfg, params, x, key):
    num_z = cfg["num_z"]
    n = x.shape[0]

    # ---- encoder: [Conv2d -> GELU -> Dropout]* -> Flatten
    h = x.transpose(1, 0, 2, 3)                       # internal (C, N, H, W)
    for w, b in params["enc"]:
        h = conv2d_cnhw(h, w, b, stride=2, padding=1, act="gelu")
        # TODO(synk): nn.Dropout(p=0.1) treated as identity (eval-mode forward).
    h_flat = h.transpose(1, 0, 2, 3).reshape(n, -1)   # == torch Flatten (NCHW)

    # ---- fused mu/logvar + reparameterize + decoder Linear
    eps = jax.random.normal(key, (n, num_z), jnp.float32)
    # TODO(synk): eps could be drawn in-kernel via pltpu.prng_seed/prng_random_bits.
    mu, logvar, h_dec = latent_fused(
        h_flat, params["z_mu_w"], params["z_mu_b"],
        params["z_logvar_w"], params["z_logvar_b"],
        eps, params["dec_lin_w"], params["dec_lin_b"])

    # ---- decoder: Unflatten -> [ConvT -> GELU -> Dropout]* -> sigmoid
    h = h_dec.reshape(n, cfg["channels"][-1], cfg["eh"], cfg["ew"])
    h = h.transpose(1, 0, 2, 3)                       # (C, N, eh, ew)
    n_dec = len(params["dec"])
    for idx, (w, b) in enumerate(params["dec"]):
        act = "gelu_sigmoid" if idx == n_dec - 1 else "gelu"
        h = conv_transpose2d_cnhw(h, w, b, act=act)
    recon = h.transpose(1, 0, 2, 3)                   # back to NCHW
    return recon, mu, logvar


if __name__ == "__main__":
    input_dim = (16, 16, 4)          # (height, width, ch)
    channels = [4, 8, 16]            # channels[0] == input ch
    num_z = 8
    batch = 2

    root = jax.random.PRNGKey(0)
    kp, kx, keps = jax.random.split(root, 3)
    params, cfg = make_vae_params(kp, input_dim, channels, num_z)
    x = jax.random.normal(kx, (batch, channels[0], input_dim[0], input_dim[1]),
                          jnp.float32)

    fwd = jax.jit(functools.partial(vae_forward, cfg))
    recon, mu, logvar = fwd(params, x, keps)
    jax.block_until_ready((recon, mu, logvar))

    assert recon.shape == (batch, channels[0], input_dim[0], input_dim[1])
    assert mu.shape == (batch, num_z) and logvar.shape == (batch, num_z)
    assert bool(jnp.all(jnp.isfinite(recon)))
    assert bool(jnp.all((recon >= 0.0) & (recon <= 1.0)))
    print("KERNEL_OK")
</pallas_src>

<mosaic_0001>
module attributes {stable_mosaic.version = 11 : i64} {
  func.func @_bmm_bias_act_kernel(%arg0: i32, %arg1: i32, %arg2: i32, %arg3: memref<1x8x48xbf16, #tpu.memory_space<vmem>>, %arg4: memref<1x48x128xbf16, #tpu.memory_space<vmem>>, %arg5: memref<1x8x1xf32, #tpu.memory_space<vmem>>, %arg6: memref<1x8x128xf32, #tpu.memory_space<vmem>>, %arg7: memref<8x128xf32, #tpu.memory_space<vmem>>) attributes {dimension_semantics = [#tpu.dimension_semantics<parallel>, #tpu.dimension_semantics<parallel>, #tpu.dimension_semantics<arbitrary>], iteration_bounds = array<i64: 1, 1, 1>, scalar_prefetch = 0 : i64, scratch_operands = 1 : i64, tpu.core_type = #tpu.core_type<tc>, window_params = [{transform_indices = @transform_0, window_bounds = array<i64: 1, 8, 48>}, {transform_indices = @transform_1, window_bounds = array<i64: 1, 48, 128>}, {transform_indices = @transform_2, window_bounds = array<i64: 1, 8, 1>}, {transform_indices = @transform_3, window_bounds = array<i64: 1, 8, 128>}]} {
    %c0_i32 = arith.constant 0 : i32
    %0 = arith.cmpi eq, %arg2, %c0_i32 : i32
    %1 = arith.extui %0 : i1 to i32
    %c0_i32_0 = arith.constant 0 : i32
    %2 = arith.cmpi ne, %1, %c0_i32_0 : i32
    scf.if %2 {
      %cst_12 = arith.constant 0.000000e+00 : f32
      %14 = vector.broadcast %cst_12 : f32 to vector<8x128xf32>
      %c0_13 = arith.constant 0 : index
      %c0_14 = arith.constant 0 : index
      %15 = vector.load %arg7[%c0_13, %c0_14] : memref<8x128xf32, #tpu.memory_space<vmem>>, vector<8x128xf32>
      tpu.vector_store %arg7[%c0_13, %c0_14], %14 {strides = array<i32>} : memref<8x128xf32, #tpu.memory_space<vmem>>, vector<8x128xf32>,
    } else {
    }
    %c0 = arith.constant 0 : index
    %c0_1 = arith.constant 0 : index
    %3 = vector.load %arg7[%c0, %c0_1] : memref<8x128xf32, #tpu.memory_space<vmem>>, vector<8x128xf32>
    %c0_2 = arith.constant 0 : index
    %c0_3 = arith.constant 0 : index
    %c0_4 = arith.constant 0 : index
    %4 = vector.load %arg3[%c0_2, %c0_3, %c0_4] : memref<1x8x48xbf16, #tpu.memory_space<vmem>>, vector<1x8x48xbf16>
    %5 = vector.shape_cast %4 : vector<1x8x48xbf16> to vector<8x48xbf16>
    %c0_5 = arith.constant 0 : index
    %c0_6 = arith.constant 0 : index
    %c0_7 = arith.constant 0 : index
    %6 = vector.load %arg4[%c0_5, %c0_6, %c0_7] : memref<1x48x128xbf16, #tpu.memory_space<vmem>>, vector<1x48x128xbf16>
    %7 = vector.shape_cast %6 : vector<1x48x128xbf16> to vector<48x128xbf16>
    %cst = arith.constant dense<0.000000e+00> : vector<8x128xf32>
    %8 = tpu.matmul %5, %7, %cst {dimension_numbers = #tpu.dot_dimension_numbers<[1], [0], [0], [1], [0, 0, 1, 1], [], []>} : vector<8x48xbf16>, vector<48x128xbf16>, vector<8x128xf32> -> vector<8x128xf32>
    %9 = arith.addf %3, %8 : vector<8x128xf32>
    %c0_8 = arith.constant 0 : index
    %c0_9 = arith.constant 0 : index
    %10 = vector.load %arg7[%c0_8, %c0_9] : memref<8x128xf32, #tpu.memory_space<vmem>>, vector<8x128xf32>
    tpu.vector_store %arg7[%c0_8, %c0_9], %9 {strides = array<i32>} : memref<8x128xf32, #tpu.memory_space<vmem>>, vector<8x128xf32>,
    %c0_i32_10 = arith.constant 0 : i32
    %11 = arith.cmpi eq, %arg2, %c0_i32_10 : i32
    %12 = arith.extui %11 : i1 to i32
    %c0_i32_11 = arith.constant 0 : i32
    %13 = arith.cmpi ne, %12, %c0_i32_11 : i32
    scf.if %13 {
      %c0_12 = arith.constant 0 : index
      %c0_13 = arith.constant 0 : index
      %14 = vector.load %arg7[%c0_12, %c0_13] : memref<8x128xf32, #tpu.memory_space<vmem>>, vector<8x128xf32>
      %c0_14 = arith.constant 0 : index
      %c0_15 = arith.constant 0 : index
      %c0_16 = arith.constant 0 : index
      %15 = vector.load %arg5[%c0_14, %c0_15, %c0_16] : memref<1x8x1xf32, #tpu.memory_space<vmem>>, vector<1x8x1xf32>
      %16 = vector.shape_cast %15 : vector<1x8x1xf32> to vector<8x1xf32>
      %17 = vector.broadcast %16 : vector<8x1xf32> to vector<8x128xf32>
      %18 = arith.addf %14, %17 : vector<8x128xf32>
      %cst_17 = arith.constant 5.000000e-01 : f32
      %19 = vector.broadcast %cst_17 : f32 to vector<8x128xf32>
      %20 = arith.mulf %19, %18 : vector<8x128xf32>
      %cst_18 = arith.constant 4.471500e-02 : f32
      %21 = vector.broadcast %cst_18 : f32 to vector<8x128xf32>
      %22 = arith.mulf %21, %18 : vector<8x128xf32>
      %23 = arith.mulf %22, %18 : vector<8x128xf32>
      %24 = arith.mulf %23, %18 : vector<8x128xf32>
      %25 = arith.addf %18, %24 : vector<8x128xf32>
      %cst_19 = arith.constant 0.797884583 : f32
      %26 = vector.broadcast %cst_19 : f32 to vector<8x128xf32>
      %27 = arith.mulf %26, %25 : vector<8x128xf32>
      %28 = math.tanh %27 : vector<8x128xf32>
      %cst_20 = arith.constant 1.000000e+00 : f32
      %29 = vector.broadcast %cst_20 : f32 to vector<8x128xf32>
      %30 = arith.addf %29, %28 : vector<8x128xf32>
      %31 = arith.mulf %20, %30 : vector<8x128xf32>
      %c0_21 = arith.constant 0 : index
      %c0_22 = arith.constant 0 : index
      %c0_23 = arith.constant 0 : index
      %32 = vector.load %arg6[%c0_21, %c0_22, %c0_23] : memref<1x8x128xf32, #tpu.memory_space<vmem>>, vector<1x8x128xf32>
      %33 = vector.shape_cast %32 : vector<1x8x128xf32> to vector<8x128xf32>
      %34 = vector.shape_cast %31 : vector<8x128xf32> to vector<1x8x128xf32>
      tpu.vector_store %arg6[%c0_21, %c0_22, %c0_23], %34 {strides = array<i32>} : memref<1x8x128xf32, #tpu.memory_space<vmem>>, vector<1x8x128xf32>,
    } else {
    }
    return
  }
  func.func @transform_0(%arg0: i32, %arg1: i32, %arg2: i32) -> (i32, i32, i32) {
    %c0_i32 = arith.constant 0 : i32
    %c0_i32_0 = arith.constant 0 : i32
    return %arg0, %c0_i32, %arg2 : i32, i32, i32
  }
  func.func @transform_1(%arg0: i32, %arg1: i32, %arg2: i32) -> (i32, i32, i32) {
    %c0_i32 = arith.constant 0 : i32
    return %arg0, %arg2, %arg1 : i32, i32, i32
  }
  func.func @transform_2(%arg0: i32, %arg1: i32, %arg2: i32) -> (i32, i32, i32) {
    %c0_i32 = arith.constant 0 : i32
    %c0_i32_0 = arith.constant 0 : i32
    %c0_i32_1 = arith.constant 0 : i32
    return %arg0, %c0_i32, %c0_i32_0 : i32, i32, i32
  }
  func.func @transform_3(%arg0: i32, %arg1: i32, %arg2: i32) -> (i32, i32, i32) {
    %c0_i32 = arith.constant 0 : i32
    %c0_i32_0 = arith.constant 0 : i32
    return %arg0, %c0_i32, %arg1 : i32, i32, i32
  }
}

module attributes {stable_mosaic.version = 11 : i64} {
  func.func @_bmm_bias_act_kernel(%arg0: i32, %arg1: i32, %arg2: i32, %arg3: memref<1x16x80xbf16, #tpu.memory_space<vmem>>, %arg4: memref<1x80x128xbf16, #tpu.memory_space<vmem>>, %arg5: memref<1x16x1xf32, #tpu.memory_space<vmem>>, %arg6: memref<1x16x128xf32, #tpu.memory_space<vmem>>, %arg7: memref<16x128xf32, #tpu.memory_space<vmem>>) attributes {dimension_semantics = [#tpu.dimension_semantics<parallel>, #tpu.dimension_semantics<parallel>, #tpu.dimension_semantics<arbitrary>], iteration_bounds = array<i64: 1, 1, 1>, scalar_prefetch = 0 : i64, scratch_operands = 1 : i64, tpu.core_type = #tpu.core_type<tc>, window_params = [{transform_indices = @transform_0, window_bounds = array<i64: 1, 16, 80>}, {transform_indices = @transform_1, window_bounds = array<i64: 1, 80, 128>}, {transform_indices = @transform_2, window_bounds = array<i64: 1, 16, 1>}, {transform_indices = @transform_3, window_bounds = array<i64: 1, 16, 128>}]} {
    %c0_i32 = arith.constant 0 : i32
    %0 = arith.cmpi eq, %arg2, %c0_i32 : i32
    %1 = arith.extui %0 : i1 to i32
    %c0_i32_0 = arith.constant 0 : i32
    %2 = arith.cmpi ne, %1, %c0_i32_0 : i32
    scf.if %2 {
      %cst_12 = arith.constant 0.000000e+00 : f32
      %14 = vector.broadcast %cst_12 : f32 to vector<16x128xf32>
      %c0_13 = arith.constant 0 : index
      %c0_14 = arith.constant 0 : index
      %15 = vector.load %arg7[%c0_13, %c0_14] : memref<16x128xf32, #tpu.memory_space<vmem>>, vector<16x128xf32>
      tpu.vector_store %arg7[%c0_13, %c0_14], %14 {strides = array<i32>} : memref<16x128xf32, #tpu.memory_space<vmem>>, vector<16x128xf32>,
    } else {
    }
    %c0 = arith.constant 0 : index
    %c0_1 = arith.constant 0 : index
    %3 = vector.load %arg7[%c0, %c0_1] : memref<16x128xf32, #tpu.memory_space<vmem>>, vector<16x128xf32>
    %c0_2 = arith.constant 0 : index
    %c0_3 = arith.constant 0 : index
    %c0_4 = arith.constant 0 : index
    %4 = vector.load %arg3[%c0_2, %c0_3, %c0_4] : memref<1x16x80xbf16, #tpu.memory_space<vmem>>, vector<1x16x80xbf16>
    %5 = vector.shape_cast %4 : vector<1x16x80xbf16> to vector<16x80xbf16>
    %c0_5 = arith.constant 0 : index
    %c0_6 = arith.constant 0 : index
    %c0_7 = arith.constant 0 : index
    %6 = vector.load %arg4[%c0_5, %c0_6, %c0_7] : memref<1x80x128xbf16, #tpu.memory_space<vmem>>, vector<1x80x128xbf16>
    %7 = vector.shape_cast %6 : vector<1x80x128xbf16> to vector<80x128xbf16>
    %cst = arith.constant dense<0.000000e+00> : vector<16x128xf32>
    %8 = tpu.matmul %5, %7, %cst {dimension_numbers = #tpu.dot_dimension_numbers<[1], [0], [0], [1], [0, 0, 1, 1], [], []>} : vector<16x80xbf16>, vector<80x128xbf16>, vector<16x128xf32> -> vector<16x128xf32>
    %9 = arith.addf %3, %8 : vector<16x128xf32>
    %c0_8 = arith.constant 0 : index
    %c0_9 = arith.constant 0 : index
    %10 = vector.load %arg7[%c0_8, %c0_9] : memref<16x128xf32, #tpu.memory_space<vmem>>, vector<16x128xf32>
    tpu.vector_store %arg7[%c0_8, %c0_9], %9 {strides = array<i32>} : memref<16x128xf32, #tpu.memory_space<vmem>>, vector<16x128xf32>,
    %c0_i32_10 = arith.constant 0 : i32
    %11 = arith.cmpi eq, %arg2, %c0_i32_10 : i32
    %12 = arith.extui %11 : i1 to i32
    %c0_i32_11 = arith.constant 0 : i32
    %13 = arith.cmpi ne, %12, %c0_i32_11 : i32
    scf.if %13 {
      %c0_12 = arith.constant 0 : index
      %c0_13 = arith.constant 0 : index
      %14 = vector.load %arg7[%c0_12, %c0_13] : memref<16x128xf32, #tpu.memory_space<vmem>>, vector<16x128xf32>
      %c0_14 = arith.constant 0 : index
      %c0_15 = arith.constant 0 : index
      %c0_16 = arith.constant 0 : index
      %15 = vector.load %arg5[%c0_14, %c0_15, %c0_16] : memref<1x16x1xf32, #tpu.memory_space<vmem>>, vector<1x16x1xf32>
      %16 = vector.shape_cast %15 : vector<1x16x1xf32> to vector<16x1xf32>
      %17 = vector.broadcast %16 : vector<16x1xf32> to vector<16x128xf32>
      %18 = arith.addf %14, %17 : vector<16x128xf32>
      %cst_17 = arith.constant 5.000000e-01 : f32
      %19 = vector.broadcast %cst_17 : f32 to vector<16x128xf32>
      %20 = arith.mulf %19, %18 : vector<16x128xf32>
      %cst_18 = arith.constant 4.471500e-02 : f32
      %21 = vector.broadcast %cst_18 : f32 to vector<16x128xf32>
      %22 = arith.mulf %21, %18 : vector<16x128xf32>
      %23 = arith.mulf %22, %18 : vector<16x128xf32>
      %24 = arith.mulf %23, %18 : vector<16x128xf32>
      %25 = arith.addf %18, %24 : vector<16x128xf32>
      %cst_19 = arith.constant 0.797884583 : f32
      %26 = vector.broadcast %cst_19 : f32 to vector<16x128xf32>
      %27 = arith.mulf %26, %25 : vector<16x128xf32>
      %28 = math.tanh %27 : vector<16x128xf32>
      %cst_20 = arith.constant 1.000000e+00 : f32
      %29 = vector.broadcast %cst_20 : f32 to vector<16x128xf32>
      %30 = arith.addf %29, %28 : vector<16x128xf32>
      %31 = arith.mulf %20, %30 : vector<16x128xf32>
      %c0_21 = arith.constant 0 : index
      %c0_22 = arith.constant 0 : index
      %c0_23 = arith.constant 0 : index
      %32 = vector.load %arg6[%c0_21, %c0_22, %c0_23] : memref<1x16x128xf32, #tpu.memory_space<vmem>>, vector<1x16x128xf32>
      %33 = vector.shape_cast %32 : vector<1x16x128xf32> to vector<16x128xf32>
      %34 = vector.shape_cast %31 : vector<16x128xf32> to vector<1x16x128xf32>
      tpu.vector_store %arg6[%c0_21, %c0_22, %c0_23], %34 {strides = array<i32>} : memref<1x16x128xf32, #tpu.memory_space<vmem>>, vector<1x16x128xf32>,
    } else {
    }
    return
  }
  func.func @transform_0(%arg0: i32, %arg1: i32, %arg2: i32) -> (i32, i32, i32) {
    %c0_i32 = arith.constant 0 : i32
    %c0_i32_0 = arith.constant 0 : i32
    return %arg0, %c0_i32, %arg2 : i32, i32, i32
  }
  func.func @transform_1(%arg0: i32, %arg1: i32, %arg2: i32) -> (i32, i32, i32) {
    %c0_i32 = arith.constant 0 : i32
    return %arg0, %arg2, %arg1 : i32, i32, i32
  }
  func.func @transform_2(%arg0: i32, %arg1: i32, %arg2: i32) -> (i32, i32, i32) {
    %c0_i32 = arith.constant 0 : i32
    %c0_i32_0 = arith.constant 0 : i32
    %c0_i32_1 = arith.constant 0 : i32
    return %arg0, %c0_i32, %c0_i32_0 : i32, i32, i32
  }
  func.func @transform_3(%arg0: i32, %arg1: i32, %arg2: i32) -> (i32, i32, i32) {
    %c0_i32 = arith.constant 0 : i32
    %c0_i32_0 = arith.constant 0 : i32
    return %arg0, %c0_i32, %arg1 : i32, i32, i32
  }
}

module attributes {stable_mosaic.version = 11 : i64} {
  func.func @_latent_kernel(%arg0: i32, %arg1: memref<2x256xbf16, #tpu.memory_space<vmem>>, %arg2: memref<256x256xbf16, #tpu.memory_space<vmem>>, %arg3: memref<1x256xf32, #tpu.memory_space<vmem>>, %arg4: memref<2x128xf32, #tpu.memory_space<vmem>>, %arg5: memref<128x256xbf16, #tpu.memory_space<vmem>>, %arg6: memref<1x256xf32, #tpu.memory_space<vmem>>, %arg7: memref<2x256xf32, #tpu.memory_space<vmem>>, %arg8: memref<2x256xf32, #tpu.memory_space<vmem>>) attributes {dimension_semantics = [#tpu.dimension_semantics<arbitrary>], iteration_bounds = array<i64: 1>, scalar_prefetch = 0 : i64, scratch_operands = 0 : i64, tpu.core_type = #tpu.core_type<tc>, window_params = [{pipeline_mode = #tpu.pipeline_mode<synchronous>, transform_indices = @transform_0, window_bounds = array<i64: 2, 256>}, {pipeline_mode = #tpu.pipeline_mode<synchronous>, transform_indices = @transform_1, window_bounds = array<i64: 256, 256>}, {pipeline_mode = #tpu.pipeline_mode<synchronous>, transform_indices = @transform_2, window_bounds = array<i64: 1, 256>}, {pipeline_mode = #tpu.pipeline_mode<synchronous>, transform_indices = @transform_3, window_bounds = array<i64: 2, 128>}, {pipeline_mode = #tpu.pipeline_mode<synchronous>, transform_indices = @transform_4, window_bounds = array<i64: 128, 256>}, {pipeline_mode = #tpu.pipeline_mode<synchronous>, transform_indices = @transform_5, window_bounds = array<i64: 1, 256>}, {pipeline_mode = #tpu.pipeline_mode<synchronous>, transform_indices = @transform_6, window_bounds = array<i64: 2, 256>}, {pipeline_mode = #tpu.pipeline_mode<synchronous>, transform_indices = @transform_7, window_bounds = array<i64: 2, 256>}]} {
    %c0 = arith.constant 0 : index
    %c0_0 = arith.constant 0 : index
    %0 = vector.load %arg1[%c0, %c0_0] : memref<2x256xbf16, #tpu.memory_space<vmem>>, vector<2x256xbf16>
    %c0_1 = arith.constant 0 : index
    %c0_2 = arith.constant 0 : index
    %1 = vector.load %arg2[%c0_1, %c0_2] : memref<256x256xbf16, #tpu.memory_space<vmem>>, vector<256x256xbf16>
    %cst = arith.constant dense<0.000000e+00> : vector<2x256xf32>
    %2 = tpu.matmul %0, %1, %cst {dimension_numbers = #tpu.dot_dimension_numbers<[1], [0], [0], [1], [0, 0, 1, 1], [], []>} : vector<2x256xbf16>, vector<256x256xbf16>, vector<2x256xf32> -> vector<2x256xf32>
    %c0_3 = arith.constant 0 : index
    %c0_4 = arith.constant 0 : index
    %3 = vector.load %arg3[%c0_3, %c0_4] : memref<1x256xf32, #tpu.memory_space<vmem>>, vector<1x256xf32>
    %4 = vector.broadcast %3 : vector<1x256xf32> to vector<2x256xf32>
    %5 = arith.addf %2, %4 : vector<2x256xf32>
    %6 = vector.extract_strided_slice %5 {offsets = [0, 0], sizes = [2, 128], strides = [1, 1]} : vector<2x256xf32> to vector<2x128xf32>
    %7 = vector.extract_strided_slice %5 {offsets = [0, 128], sizes = [2, 128], strides = [1, 1]} : vector<2x256xf32> to vector<2x128xf32>
    %c0_5 = arith.constant 0 : index
    %c0_6 = arith.constant 0 : index
    %8 = vector.load %arg4[%c0_5, %c0_6] : memref<2x128xf32, #tpu.memory_space<vmem>>, vector<2x128xf32>
    %cst_7 = arith.constant 5.000000e-01 : f32
    %9 = vector.broadcast %cst_7 : f32 to vector<2x128xf32>
    %10 = arith.mulf %9, %7 : vector<2x128xf32>
    %11 = math.exp %10 : vector<2x128xf32>
    %12 = arith.mulf %8, %11 : vector<2x128xf32>
    %13 = arith.addf %6, %12 : vector<2x128xf32>
    %14 = arith.truncf %13 : vector<2x128xf32> to vector<2x128xbf16>
    %c0_8 = arith.constant 0 : index
    %c0_9 = arith.constant 0 : index
    %15 = vector.load %arg5[%c0_8, %c0_9] : memref<128x256xbf16, #tpu.memory_space<vmem>>, vector<128x256xbf16>
    %cst_10 = arith.constant dense<0.000000e+00> : vector<2x256xf32>
    %16 = tpu.matmul %14, %15, %cst_10 {dimension_numbers = #tpu.dot_dimension_numbers<[1], [0], [0], [1], [0, 0, 1, 1], [], []>} : vector<2x128xbf16>, vector<128x256xbf16>, vector<2x256xf32> -> vector<2x256xf32>
    %c0_11 = arith.constant 0 : index
    %c0_12 = arith.constant 0 : index
    %17 = vector.load %arg6[%c0_11, %c0_12] : memref<1x256xf32, #tpu.memory_space<vmem>>, vector<1x256xf32>
    %18 = vector.broadcast %17 : vector<1x256xf32> to vector<2x256xf32>
    %19 = arith.addf %16, %18 : vector<2x256xf32>
    %c0_13 = arith.constant 0 : index
    %c0_14 = arith.constant 0 : index
    %20 = vector.load %arg7[%c0_13, %c0_14] : memref<2x256xf32, #tpu.memory_space<vmem>>, vector<2x256xf32>
    tpu.vector_store %arg7[%c0_13, %c0_14], %5 {strides = array<i32>} : memref<2x256xf32, #tpu.memory_space<vmem>>, vector<2x256xf32>,
    %c0_15 = arith.constant 0 : index
    %c0_16 = arith.constant 0 : index
    %21 = vector.load %arg8[%c0_15, %c0_16] : memref<2x256xf32, #tpu.memory_space<vmem>>, vector<2x256xf32>
    tpu.vector_store %arg8[%c0_15, %c0_16], %19 {strides = array<i32>} : memref<2x256xf32, #tpu.memory_space<vmem>>, vector<2x256xf32>,
    return
  }
  func.func @transform_0(%arg0: i32) -> (i32, i32) {
    %c0_i32 = arith.constant 0 : i32
    %c0_i32_0 = arith.constant 0 : i32
    %c0_i32_1 = arith.constant 0 : i32
    return %c0_i32, %c0_i32_0 : i32, i32
  }
  func.func @transform_1(%arg0: i32) -> (i32, i32) {
    %c0_i32 = arith.constant 0 : i32
    %c0_i32_0 = arith.constant 0 : i32
    %c0_i32_1 = arith.constant 0 : i32
    return %c0_i32, %c0_i32_0 : i32, i32
  }
  func.func @transform_2(%arg0: i32) -> (i32, i32) {
    %c0_i32 = arith.constant 0 : i32
    %c0_i32_0 = arith.constant 0 : i32
    %c0_i32_1 = arith.constant 0 : i32
    return %c0_i32, %c0_i32_0 : i32, i32
  }
  func.func @transform_3(%arg0: i32) -> (i32, i32) {
    %c0_i32 = arith.constant 0 : i32
    %c0_i32_0 = arith.constant 0 : i32
    %c0_i32_1 = arith.constant 0 : i32
    return %c0_i32, %c0_i32_0 : i32, i32
  }
  func.func @transform_4(%arg0: i32) -> (i32, i32) {
    %c0_i32 = arith.constant 0 : i32
    %c0_i32_0 = arith.constant 0 : i32
    %c0_i32_1 = arith.constant 0 : i32
    return %c0_i32, %c0_i32_0 : i32, i32
  }
  func.func @transform_5(%arg0: i32) -> (i32, i32) {
    %c0_i32 = arith.constant 0 : i32
    %c0_i32_0 = arith.constant 0 : i32
    %c0_i32_1 = arith.constant 0 : i32
    return %c0_i32, %c0_i32_0 : i32, i32
  }
  func.func @transform_6(%arg0: i32) -> (i32, i32) {
    %c0_i32 = arith.constant 0 : i32
    %c0_i32_0 = arith.constant 0 : i32
    %c0_i32_1 = arith.constant 0 : i32
    return %c0_i32, %c0_i32_0 : i32, i32
  }
  func.func @transform_7(%arg0: i32) -> (i32, i32) {
    %c0_i32 = arith.constant 0 : i32
    %c0_i32_0 = arith.constant 0 : i32
    %c0_i32_1 = arith.constant 0 : i32
    return %c0_i32, %c0_i32_0 : i32, i32
  }
}

module attributes {stable_mosaic.version = 11 : i64} {
  func.func @_bmm_bias_act_kernel(%arg0: i32, %arg1: i32, %arg2: i32, %arg3: memref<1x8x64xbf16, #tpu.memory_space<vmem>>, %arg4: memref<1x64x128xbf16, #tpu.memory_space<vmem>>, %arg5: memref<1x8x1xf32, #tpu.memory_space<vmem>>, %arg6: memref<1x8x128xf32, #tpu.memory_space<vmem>>, %arg7: memref<8x128xf32, #tpu.memory_space<vmem>>) attributes {dimension_semantics = [#tpu.dimension_semantics<parallel>, #tpu.dimension_semantics<parallel>, #tpu.dimension_semantics<arbitrary>], iteration_bounds = array<i64: 4, 1, 1>, scalar_prefetch = 0 : i64, scratch_operands = 1 : i64, tpu.core_type = #tpu.core_type<tc>, window_params = [{transform_indices = @transform_0, window_bounds = array<i64: 1, 8, 64>}, {transform_indices = @transform_1, window_bounds = array<i64: 1, 64, 128>}, {transform_indices = @transform_2, window_bounds = array<i64: 1, 8, 1>}, {transform_indices = @transform_3, window_bounds = array<i64: 1, 8, 128>}]} {
    %c0_i32 = arith.constant 0 : i32
    %0 = arith.cmpi eq, %arg2, %c0_i32 : i32
    %1 = arith.extui %0 : i1 to i32
    %c0_i32_0 = arith.constant 0 : i32
    %2 = arith.cmpi ne, %1, %c0_i32_0 : i32
    scf.if %2 {
      %cst_12 = arith.constant 0.000000e+00 : f32
      %14 = vector.broadcast %cst_12 : f32 to vector<8x128xf32>
      %c0_13 = arith.constant 0 : index
      %c0_14 = arith.constant 0 : index
      %15 = vector.load %arg7[%c0_13, %c0_14] : memref<8x128xf32, #tpu.memory_space<vmem>>, vector<8x128xf32>
      tpu.vector_store %arg7[%c0_13, %c0_14], %14 {strides = array<i32>} : memref<8x128xf32, #tpu.memory_space<vmem>>, vector<8x128xf32>,
    } else {
    }
    %c0 = arith.constant 0 : index
    %c0_1 = arith.constant 0 : index
    %3 = vector.load %arg7[%c0, %c0_1] : memref<8x128xf32, #tpu.memory_space<vmem>>, vector<8x128xf32>
    %c0_2 = arith.constant 0 : index
    %c0_3 = arith.constant 0 : index
    %c0_4 = arith.constant 0 : index
    %4 = vector.load %arg3[%c0_2, %c0_3, %c0_4] : memref<1x8x64xbf16, #tpu.memory_space<vmem>>, vector<1x8x64xbf16>
    %5 = vector.shape_cast %4 : vector<1x8x64xbf16> to vector<8x64xbf16>
    %c0_5 = arith.constant 0 : index
    %c0_6 = arith.constant 0 : index
    %c0_7 = arith.constant 0 : index
    %6 = vector.load %arg4[%c0_5, %c0_6, %c0_7] : memref<1x64x128xbf16, #tpu.memory_space<vmem>>, vector<1x64x128xbf16>
    %7 = vector.shape_cast %6 : vector<1x64x128xbf16> to vector<64x128xbf16>
    %cst = arith.constant dense<0.000000e+00> : vector<8x128xf32>
    %8 = tpu.matmul %5, %7, %cst {dimension_numbers = #tpu.dot_dimension_numbers<[1], [0], [0], [1], [0, 0, 1, 1], [], []>} : vector<8x64xbf16>, vector<64x128xbf16>, vector<8x128xf32> -> vector<8x128xf32>
    %9 = arith.addf %3, %8 : vector<8x128xf32>
    %c0_8 = arith.constant 0 : index
    %c0_9 = arith.constant 0 : index
    %10 = vector.load %arg7[%c0_8, %c0_9] : memref<8x128xf32, #tpu.memory_space<vmem>>, vector<8x128xf32>
    tpu.vector_store %arg7[%c0_8, %c0_9], %9 {strides = array<i32>} : memref<8x128xf32, #tpu.memory_space<vmem>>, vector<8x128xf32>,
    %c0_i32_10 = arith.constant 0 : i32
    %11 = arith.cmpi eq, %arg2, %c0_i32_10 : i32
    %12 = arith.extui %11 : i1 to i32
    %c0_i32_11 = arith.constant 0 : i32
    %13 = arith.cmpi ne, %12, %c0_i32_11 : i32
    scf.if %13 {
      %c0_12 = arith.constant 0 : index
      %c0_13 = arith.constant 0 : index
      %14 = vector.load %arg7[%c0_12, %c0_13] : memref<8x128xf32, #tpu.memory_space<vmem>>, vector<8x128xf32>
      %c0_14 = arith.constant 0 : index
      %c0_15 = arith.constant 0 : index
      %c0_16 = arith.constant 0 : index
      %15 = vector.load %arg5[%c0_14, %c0_15, %c0_16] : memref<1x8x1xf32, #tpu.memory_space<vmem>>, vector<1x8x1xf32>
      %16 = vector.shape_cast %15 : vector<1x8x1xf32> to vector<8x1xf32>
      %17 = vector.broadcast %16 : vector<8x1xf32> to vector<8x128xf32>
      %18 = arith.addf %14, %17 : vector<8x128xf32>
      %cst_17 = arith.constant 5.000000e-01 : f32
      %19 = vector.broadcast %cst_17 : f32 to vector<8x128xf32>
      %20 = arith.mulf %19, %18 : vector<8x128xf32>
      %cst_18 = arith.constant 4.471500e-02 : f32
      %21 = vector.broadcast %cst_18 : f32 to vector<8x128xf32>
      %22 = arith.mulf %21, %18 : vector<8x128xf32>
      %23 = arith.mulf %22, %18 : vector<8x128xf32>
      %24 = arith.mulf %23, %18 : vector<8x128xf32>
      %25 = arith.addf %18, %24 : vector<8x128xf32>
      %cst_19 = arith.constant 0.797884583 : f32
      %26 = vector.broadcast %cst_19 : f32 to vector<8x128xf32>
      %27 = arith.mulf %26, %25 : vector<8x128xf32>
      %28 = math.tanh %27 : vector<8x128xf32>
      %cst_20 = arith.constant 1.000000e+00 : f32
      %29 = vector.broadcast %cst_20 : f32 to vector<8x128xf32>
      %30 = arith.addf %29, %28 : vector<8x128xf32>
      %31 = arith.mulf %20, %30 : vector<8x128xf32>
      %c0_21 = arith.constant 0 : index
      %c0_22 = arith.constant 0 : index
      %c0_23 = arith.constant 0 : index
      %32 = vector.load %arg6[%c0_21, %c0_22, %c0_23] : memref<1x8x128xf32, #tpu.memory_space<vmem>>, vector<1x8x128xf32>
      %33 = vector.shape_cast %32 : vector<1x8x128xf32> to vector<8x128xf32>
      %34 = vector.shape_cast %31 : vector<8x128xf32> to vector<1x8x128xf32>
      tpu.vector_store %arg6[%c0_21, %c0_22, %c0_23], %34 {strides = array<i32>} : memref<1x8x128xf32, #tpu.memory_space<vmem>>, vector<1x8x128xf32>,
    } else {
    }
    return
  }
  func.func @transform_0(%arg0: i32, %arg1: i32, %arg2: i32) -> (i32, i32, i32) {
    %c0_i32 = arith.constant 0 : i32
    %c0_i32_0 = arith.constant 0 : i32
    return %arg0, %c0_i32, %arg2 : i32, i32, i32
  }
  func.func @transform_1(%arg0: i32, %arg1: i32, %arg2: i32) -> (i32, i32, i32) {
    %c0_i32 = arith.constant 0 : i32
    return %arg0, %arg2, %arg1 : i32, i32, i32
  }
  func.func @transform_2(%arg0: i32, %arg1: i32, %arg2: i32) -> (i32, i32, i32) {
    %c0_i32 = arith.constant 0 : i32
    %c0_i32_0 = arith.constant 0 : i32
    %c0_i32_1 = arith.constant 0 : i32
    return %arg0, %c0_i32, %c0_i32_0 : i32, i32, i32
  }
  func.func @transform_3(%arg0: i32, %arg1: i32, %arg2: i32) -> (i32, i32, i32) {
    %c0_i32 = arith.constant 0 : i32
    %c0_i32_0 = arith.constant 0 : i32
    return %arg0, %c0_i32, %arg1 : i32, i32, i32
  }
}

module attributes {stable_mosaic.version = 11 : i64} {
  func.func @_bmm_bias_act_kernel(%arg0: i32, %arg1: i32, %arg2: i32, %arg3: memref<1x8x32xbf16, #tpu.memory_space<vmem>>, %arg4: memref<1x32x128xbf16, #tpu.memory_space<vmem>>, %arg5: memref<1x8x1xf32, #tpu.memory_space<vmem>>, %arg6: memref<1x8x128xf32, #tpu.memory_space<vmem>>, %arg7: memref<8x128xf32, #tpu.memory_space<vmem>>) attributes {dimension_semantics = [#tpu.dimension_semantics<parallel>, #tpu.dimension_semantics<parallel>, #tpu.dimension_semantics<arbitrary>], iteration_bounds = array<i64: 4, 1, 1>, scalar_prefetch = 0 : i64, scratch_operands = 1 : i64, tpu.core_type = #tpu.core_type<tc>, window_params = [{transform_indices = @transform_0, window_bounds = array<i64: 1, 8, 32>}, {transform_indices = @transform_1, window_bounds = array<i64: 1, 32, 128>}, {transform_indices = @transform_2, window_bounds = array<i64: 1, 8, 1>}, {transform_indices = @transform_3, window_bounds = array<i64: 1, 8, 128>}]} {
    %c0_i32 = arith.constant 0 : i32
    %0 = arith.cmpi eq, %arg2, %c0_i32 : i32
    %1 = arith.extui %0 : i1 to i32
    %c0_i32_0 = arith.constant 0 : i32
    %2 = arith.cmpi ne, %1, %c0_i32_0 : i32
    scf.if %2 {
      %cst_12 = arith.constant 0.000000e+00 : f32
      %14 = vector.broadcast %cst_12 : f32 to vector<8x128xf32>
      %c0_13 = arith.constant 0 : index
      %c0_14 = arith.constant 0 : index
      %15 = vector.load %arg7[%c0_13, %c0_14] : memref<8x128xf32, #tpu.memory_space<vmem>>, vector<8x128xf32>
      tpu.vector_store %arg7[%c0_13, %c0_14], %14 {strides = array<i32>} : memref<8x128xf32, #tpu.memory_space<vmem>>, vector<8x128xf32>,
    } else {
    }
    %c0 = arith.constant 0 : index
    %c0_1 = arith.constant 0 : index
    %3 = vector.load %arg7[%c0, %c0_1] : memref<8x128xf32, #tpu.memory_space<vmem>>, vector<8x128xf32>
    %c0_2 = arith.constant 0 : index
    %c0_3 = arith.constant 0 : index
    %c0_4 = arith.constant 0 : index
    %4 = vector.load %arg3[%c0_2, %c0_3, %c0_4] : memref<1x8x32xbf16, #tpu.memory_space<vmem>>, vector<1x8x32xbf16>
    %5 = vector.shape_cast %4 : vector<1x8x32xbf16> to vector<8x32xbf16>
    %c0_5 = arith.constant 0 : index
    %c0_6 = arith.constant 0 : index
    %c0_7 = arith.constant 0 : index
    %6 = vector.load %arg4[%c0_5, %c0_6, %c0_7] : memref<1x32x128xbf16, #tpu.memory_space<vmem>>, vector<1x32x128xbf16>
    %7 = vector.shape_cast %6 : vector<1x32x128xbf16> to vector<32x128xbf16>
    %cst = arith.constant dense<0.000000e+00> : vector<8x128xf32>
    %8 = tpu.matmul %5, %7, %cst {dimension_numbers = #tpu.dot_dimension_numbers<[1], [0], [0], [1], [0, 0, 1, 1], [], []>} : vector<8x32xbf16>, vector<32x128xbf16>, vector<8x128xf32> -> vector<8x128xf32>
    %9 = arith.addf %3, %8 : vector<8x128xf32>
    %c0_8 = arith.constant 0 : index
    %c0_9 = arith.constant 0 : index
    %10 = vector.load %arg7[%c0_8, %c0_9] : memref<8x128xf32, #tpu.memory_space<vmem>>, vector<8x128xf32>
    tpu.vector_store %arg7[%c0_8, %c0_9], %9 {strides = array<i32>} : memref<8x128xf32, #tpu.memory_space<vmem>>, vector<8x128xf32>,
    %c0_i32_10 = arith.constant 0 : i32
    %11 = arith.cmpi eq, %arg2, %c0_i32_10 : i32
    %12 = arith.extui %11 : i1 to i32
    %c0_i32_11 = arith.constant 0 : i32
    %13 = arith.cmpi ne, %12, %c0_i32_11 : i32
    scf.if %13 {
      %c0_12 = arith.constant 0 : index
      %c0_13 = arith.constant 0 : index
      %14 = vector.load %arg7[%c0_12, %c0_13] : memref<8x128xf32, #tpu.memory_space<vmem>>, vector<8x128xf32>
      %c0_14 = arith.constant 0 : index
      %c0_15 = arith.constant 0 : index
      %c0_16 = arith.constant 0 : index
      %15 = vector.load %arg5[%c0_14, %c0_15, %c0_16] : memref<1x8x1xf32, #tpu.memory_space<vmem>>, vector<1x8x1xf32>
      %16 = vector.shape_cast %15 : vector<1x8x1xf32> to vector<8x1xf32>
      %17 = vector.broadcast %16 : vector<8x1xf32> to vector<8x128xf32>
      %18 = arith.addf %14, %17 : vector<8x128xf32>
      %cst_17 = arith.constant 5.000000e-01 : f32
      %19 = vector.broadcast %cst_17 : f32 to vector<8x128xf32>
      %20 = arith.mulf %19, %18 : vector<8x128xf32>
      %cst_18 = arith.constant 4.471500e-02 : f32
      %21 = vector.broadcast %cst_18 : f32 to vector<8x128xf32>
      %22 = arith.mulf %21, %18 : vector<8x128xf32>
      %23 = arith.mulf %22, %18 : vector<8x128xf32>
      %24 = arith.mulf %23, %18 : vector<8x128xf32>
      %25 = arith.addf %18, %24 : vector<8x128xf32>
      %cst_19 = arith.constant 0.797884583 : f32
      %26 = vector.broadcast %cst_19 : f32 to vector<8x128xf32>
      %27 = arith.mulf %26, %25 : vector<8x128xf32>
      %28 = math.tanh %27 : vector<8x128xf32>
      %cst_20 = arith.constant 1.000000e+00 : f32
      %29 = vector.broadcast %cst_20 : f32 to vector<8x128xf32>
      %30 = arith.addf %29, %28 : vector<8x128xf32>
      %31 = arith.mulf %20, %30 : vector<8x128xf32>
      %32 = arith.negf %31 : vector<8x128xf32>
      %33 = math.exp %32 : vector<8x128xf32>
      %cst_21 = arith.constant 1.000000e+00 : f32
      %34 = vector.broadcast %cst_21 : f32 to vector<8x128xf32>
      %35 = arith.addf %34, %33 : vector<8x128xf32>
      %36 = arith.divf %34, %35 : vector<8x128xf32>
      %c0_22 = arith.constant 0 : index
      %c0_23 = arith.constant 0 : index
      %c0_24 = arith.constant 0 : index
      %37 = vector.load %arg6[%c0_22, %c0_23, %c0_24] : memref<1x8x128xf32, #tpu.memory_space<vmem>>, vector<1x8x128xf32>
      %38 = vector.shape_cast %37 : vector<1x8x128xf32> to vector<8x128xf32>
      %39 = vector.shape_cast %36 : vector<8x128xf32> to vector<1x8x128xf32>
      tpu.vector_store %arg6[%c0_22, %c0_23, %c0_24], %39 {strides = array<i32>} : memref<1x8x128xf32, #tpu.memory_space<vmem>>, vector<1x8x128xf32>,
    } else {
    }
    return
  }
  func.func @transform_0(%arg0: i32, %arg1: i32, %arg2: i32) -> (i32, i32, i32) {
    %c0_i32 = arith.constant 0 : i32
    %c0_i32_0 = arith.constant 0 : i32
    return %arg0, %c0_i32, %arg2 : i32, i32, i32
  }
  func.func @transform_1(%arg0: i32, %arg1: i32, %arg2: i32) -> (i32, i32, i32) {
    %c0_i32 = arith.constant 0 : i32
    return %arg0, %arg2, %arg1 : i32, i32, i32
  }
  func.func @transform_2(%arg0: i32, %arg1: i32, %arg2: i32) -> (i32, i32, i32) {
    %c0_i32 = arith.constant 0 : i32
    %c0_i32_0 = arith.constant 0 : i32
    %c0_i32_1 = arith.constant 0 : i32
    return %arg0, %c0_i32, %c0_i32_0 : i32, i32, i32
  }
  func.func @transform_3(%arg0: i32, %arg1: i32, %arg2: i32) -> (i32, i32, i32) {
    %c0_i32 = arith.constant 0 : i32
    %c0_i32_0 = arith.constant 0 : i32
    return %arg0, %c0_i32, %arg1 : i32, i32, i32
  }
}

</mosaic_0001>

<bundles_post_ra>
// kernel: vae_forward.5
= control target key start
LH: loop header
LB: loop body
LE: loop exit
PB: predicated region body
PF: predicated region fallthrough
CT: control target
= control target key end

     0   :  { %v110_v1 = vmov 0   ;;  %vm46_vm0 = vcmask 392192   ;;  %s149_s1 = inlined_call_operand.vmem [shape: bf16[1,48,128], index: 1, kind: input, shape index: {}]   ;;  %s150_s2 = inlined_call_operand.vmem [shape: f32[1,8,1], index: 2, kind: input, shape index: {}]   ;;  %s151_s0 = inlined_call_operand.vmem [shape: bf16[1,8,48], index: 0, kind: input, shape index: {}]   ;;  %s152_s3 = inlined_call_operand.vmem [shape: f32[1,8,128], index: 3, kind: output, shape index: {}]  }
   0x1   :  { %v105_v0 = vld [vmem:[%s149_s1 + $0x10] sm:$0xff]  ;;  %107 = vset.pattern.permute.xlu0 %v110_v1  ;;  %v69_v2 = vld [vmem:[%s150_s2] sm:$0xff]  ;;  %v104_v3 = vld [vmem:[%s149_s1 + $0x8] sm:$0xff] }
   0x2   :  { %55 = vmatpush.bf16.msra.mxu0 %v105_v0  ;;  %72 = vperm.xlu0 %107, %v69_v2   ;;  %v103_v4 = vld [vmem:[%s149_s1] sm:$0xff] }
   0x3   :  { %v21_v5 = vld [vmem:[%s151_s0] sm:$0xf] }
   0x6   :  { %56 = vmatpush.bf16.msra.mxu0 %v104_v3 }
   0xa   :  { %57 = vmatpush.bf16.msra.mxu0 %v103_v4 }
   0xd   :  { %102 = vmatmul.msk.bf16.vlgmr.msra.gmra.mxu0 %vm46_vm0, %v21_v5 }
  0x74   :  { %v73_v6 = vpop.permute.xlu0 %72 }
  0x8a   :  { %v59_v7 = vpop.f32.mrf.mxu0 }
  0x8b   :  { %v75_v8 = vadd.f32 %v73_v6, %v59_v7 }
  0x8d   :  { %v77_v9 = vmul.f32 0.044715, %v75_v8  ;;  %v76_v16 = vmul.f32 0.5, %v75_v8 }
  0x8f   :  { %v78_v10 = vmul.f32 %v77_v9, %v75_v8 }
  0x91   :  { %v79_v11 = vmul.f32 %v78_v10, %v75_v8 }
  0x92   :  { %v61_v12 = vpop.f32.mrf.mxu0 }
  0x93   :  { %v80_v13 = vadd.f32 %v79_v11, %v75_v8 }
  0x95   :  { %v81_v14 = vmul.f32 0.7978846, %v80_v13 }
  0x97   :  { %108 = vtanh.f32 %v81_v14 }
  0x9d   :  { %v109_v15 = vpop.eup %108 }
  0x9e   :  { %v83_v17 = vadd.f32 1.0, %v109_v15 }
  0xa0   :  { %v84_v18 = vmul.f32 %v83_v17, %v76_v16 }
  0xa2   :  { %85 = vst [vmem:[%s152_s3] sm:$0xff] %v84_v18 }

// kernel: vae_forward.6
= control target key start
LH: loop header
LB: loop body
LE: loop exit
PB: predicated region body
PF: predicated region fallthrough
CT: control target
= control target key end

     0   :  { %v172_v1 = vmov 0   ;;  %vm70_vm0 = vcmask 654336   ;;  %s223_s1 = inlined_call_operand.vmem [shape: bf16[1,80,128], index: 1, kind: input, shape index: {}]   ;;  %s224_s2 = inlined_call_operand.vmem [shape: f32[1,16,1], index: 2, kind: input, shape index: {}]   ;;  %s225_s0 = inlined_call_operand.vmem [shape: bf16[1,16,80], index: 0, kind: input, shape index: {}]   ;;  %s226_s3 = inlined_call_operand.vmem [shape: f32[1,16,128], index: 3, kind: output, shape index: {}]  }
   0x1   :  { %v165_v0 = vld [vmem:[%s223_s1 + $0x20] sm:$0xff]  ;;  %167 = vset.pattern.permute.xlu0 %v172_v1  ;;  %v164_v2 = vld [vmem:[%s223_s1 + $0x18] sm:$0xff]  ;;  %v163_v4 = vld [vmem:[%s223_s1 + $0x10] sm:$0xff] }
   0x2   :  { %77 = vmatpush.bf16.msra.mxu0 %v165_v0  ;;  %v97_v3 = vld [vmem:[%s224_s2] sm:$0xff]  ;;  %v98_v5 = vld [vmem:[%s224_s2 + $0x8] sm:$0xff] }
   0x3   :  { %101 = vperm.xlu0 %167, %v97_v3   ;;  %v162_v6 = vld [vmem:[%s223_s1 + $0x8] sm:$0xff]  ;;  %v161_v7 = vld [vmem:[%s223_s1] sm:$0xff] }
   0x4   :  { %v160_v8 = vld [vmem:[%s225_s0] sm:$0xff] }
   0x6   :  { %78 = vmatpush.bf16.msra.mxu0 %v164_v2 }
   0xa   :  { %79 = vmatpush.bf16.msra.mxu0 %v163_v4 }
   0xb   :  { %106 = vperm.xlu0 %167, %v98_v5  }
   0xe   :  { %80 = vmatpush.bf16.msra.mxu0 %v162_v6 }
  0x12   :  { %81 = vmatpush.bf16.msra.mxu0 %v161_v7 }
  0x15   :  { %159 = vmatmul.msk.bf16.vlgmr.msra.gmra.mxu0 %vm70_vm0, %v160_v8 }
  0x75   :  { %v102_v9 = vpop.permute.xlu0 %101 }
  0x7d   :  { %v107_v15 = vpop.permute.xlu0 %106 }
  0x92   :  { %v83_v10 = vpop.f32.mrf.mxu0 }
  0x93   :  { %v109_v11 = vadd.f32 %v102_v9, %v83_v10 }
  0x95   :  { %v113_v12 = vmul.f32 0.044715, %v109_v11  ;;  %v111_v26 = vmul.f32 0.5, %v109_v11 }
  0x97   :  { %v115_v13 = vmul.f32 %v113_v12, %v109_v11 }
  0x99   :  { %v117_v14 = vmul.f32 %v115_v13, %v109_v11 }
  0x9a   :  { %v85_v16 = vpop.f32.mrf.mxu0 }
  0x9b   :  { %v119_v17 = vadd.f32 %v117_v14, %v109_v11  ;;  %v110_v18 = vadd.f32 %v107_v15, %v85_v16 }
  0x9d   :  { %v121_v19 = vmul.f32 0.7978846, %v119_v17  ;;  %v114_v20 = vmul.f32 0.044715, %v110_v18  ;;  %v112_v30 = vmul.f32 0.5, %v110_v18 }
  0x9f   :  { %168 = vtanh.f32 %v121_v19  ;;  %v116_v21 = vmul.f32 %v114_v20, %v110_v18 }
  0xa1   :  { %v118_v22 = vmul.f32 %v116_v21, %v110_v18 }
  0xa3   :  { %v120_v23 = vadd.f32 %v118_v22, %v110_v18 }
  0xa5   :  { %v169_v24 = vpop.eup %168  ;;  %v122_v25 = vmul.f32 0.7978846, %v120_v23 }
  0xa6   :  { %v125_v27 = vadd.f32 1.0, %v169_v24 }
  0xa7   :  { %170 = vtanh.f32 %v122_v25 }
  0xa8   :  { %v127_v28 = vmul.f32 %v125_v27, %v111_v26 }
  0xaa   :  { %129 = vst [vmem:[%s226_s3] sm:$0xff] %v127_v28 }
  0xad   :  { %v171_v29 = vpop.eup %170 }
  0xae   :  { %v126_v31 = vadd.f32 1.0, %v171_v29 }
  0xb0   :  { %v128_v32 = vmul.f32 %v126_v31, %v112_v30 }
  0xb2   :  { %130 = vst [vmem:[%s226_s3 + $0x8] sm:$0xff] %v128_v32 }

// kernel: vae_forward.7
= control target key start
LH: loop header
LB: loop body
LE: loop exit
PB: predicated region body
PF: predicated region fallthrough
CT: control target
= control target key end

     0   :  { %vm420_vm0 = vcmask 1041408   ;;  %s1028_s1 = inlined_call_operand.vmem [shape: bf16[256,256], index: 1, kind: input, shape index: {}]   ;;  %s1029_s0 = inlined_call_operand.vmem [shape: bf16[2,256], index: 0, kind: input, shape index: {}]   ;;  %s1030_s4 = inlined_call_operand.vmem [shape: bf16[128,256], index: 4, kind: input, shape index: {}]   ;;  %s1031_s2 = inlined_call_operand.vmem [shape: f32[1,256], index: 2, kind: input, shape index: {}]   ;;  %s1032_s6 = inlined_call_operand.vmem [shape: f32[2,256], index: 6, kind: output, shape index: {0}]   ;;  %s1033_s3 = inlined_call_operand.vmem [shape: f32[2,128], index: 3, kind: input, shape index: {}]   ;;  %s1034_s5 = inlined_call_operand.vmem [shape: f32[1,256], index: 5, kind: input, shape index: {}]   ;;  %s1035_s7 = inlined_call_operand.vmem [shape: f32[2,256], index: 7, kind: output, shape index: {1}]  }
   0x1   :  { %v644_v0 = vld [vmem:[%s1028_s1 + $0x74] sm:$0xf]  ;;  %v498_v1 = vld [vmem:[%s1028_s1 + $0x78] sm:$0xf0]  ;;  %v642_v5 = vld [vmem:[%s1028_s1 + $0x64] sm:$0xf] }
   0x2   :  { %v660_v2 = vld [vmem:[%s1028_s1 + $0xf4] sm:$0xf]  ;;  %v501_v3 = vor.u32 %v644_v0, %v498_v1  ;;  %v562_v4 = vld [vmem:[%s1028_s1 + $0xf8] sm:$0xf0]  ;;  %v490_v6 = vld [vmem:[%s1028_s1 + $0x68] sm:$0xf0] }
   0x3   :  { %v565_v7 = vor.u32 %v660_v2, %v562_v4  ;;  %v658_v8 = vld [vmem:[%s1028_s1 + $0xe4] sm:$0xf]  ;;  %v554_v9 = vld [vmem:[%s1028_s1 + $0xe8] sm:$0xf0]  ;;  %v496_v10 = vld [vmem:[%s1028_s1 + $0x70] sm:$0xf]  ;;  %v493_v11 = vor.u32 %v642_v5, %v490_v6 }
   0x4   :  { %256 = vmatpush.bf16.msra.mxu2 %v501_v3  ;;  %v645_v12 = vld [vmem:[%s1028_s1 + $0x74] sm:$0xf0]  ;;  %v640_v13 = vld [vmem:[%s1028_s1 + $0x54] sm:$0xf]  ;;  %v482_v14 = vld [vmem:[%s1028_s1 + $0x58] sm:$0xf0]  ;;  %v557_v15 = vor.u32 %v658_v8, %v554_v9 }
   0x5   :  { %269 = vmatpush.bf16.msra.mxu3 %v565_v7  ;;  %v497_v16 = vor.u32 %v645_v12, %v496_v10  ;;  %v656_v17 = vld [vmem:[%s1028_s1 + $0xd4] sm:$0xf]  ;;  %v546_v18 = vld [vmem:[%s1028_s1 + $0xd8] sm:$0xf0]  ;;  %v560_v19 = vld [vmem:[%s1028_s1 + $0xf0] sm:$0xf]  ;;  %v485_v25 = vor.u32 %v640_v13, %v482_v14 }
   0x6   :  { %v661_v20 = vld [vmem:[%s1028_s1 + $0xf4] sm:$0xf0]  ;;  %v488_v21 = vld [vmem:[%s1028_s1 + $0x60] sm:$0xf]  ;;  %v643_v22 = vld [vmem:[%s1028_s1 + $0x64] sm:$0xf0]  ;;  %v549_v29 = vor.u32 %v656_v17, %v546_v18 }
   0x7   :  { %230 = vmatpush.bf16.msra.mxu0 %v497_v16  ;;  %v561_v23 = vor.u32 %v661_v20, %v560_v19  ;;  %v489_v24 = vor.u32 %v643_v22, %v488_v21  ;;  %v638_v26 = vld [vmem:[%s1028_s1 + $0x44] sm:$0xf]  ;;  %v552_v27 = vld [vmem:[%s1028_s1 + $0xe0] sm:$0xf]  ;;  %v659_v28 = vld [vmem:[%s1028_s1 + $0xe4] sm:$0xf0] }
   0x8   :  { %257 = vmatpush.bf16.msra.mxu2 %v493_v11  ;;  %v474_v30 = vld [vmem:[%s1028_s1 + $0x48] sm:$0xf0]  ;;  %v553_v31 = vor.u32 %v659_v28, %v552_v27  ;;  %v480_v32 = vld [vmem:[%s1028_s1 + $0x50] sm:$0xf]  ;;  %v641_v33 = vld [vmem:[%s1028_s1 + $0x54] sm:$0xf0] }
   0x9   :  { %270 = vmatpush.bf16.msra.mxu3 %v557_v15  ;;  %243 = vmatpush.bf16.msra.mxu1 %v561_v23  ;;  %v654_v34 = vld [vmem:[%s1028_s1 + $0xc4] sm:$0xf]  ;;  %v538_v35 = vld [vmem:[%s1028_s1 + $0xc8] sm:$0xf0]  ;;  %v481_v36 = vor.u32 %v641_v33, %v480_v32  ;;  %v544_v37 = vld [vmem:[%s1028_s1 + $0xd0] sm:$0xf]  ;;  %v477_v39 = vor.u32 %v638_v26, %v474_v30 }
   0xa   :  { %v657_v38 = vld [vmem:[%s1028_s1 + $0xd4] sm:$0xf0]  ;;  %v472_v40 = vld [vmem:[%s1028_s1 + $0x40] sm:$0xf]  ;;  %v639_v41 = vld [vmem:[%s1028_s1 + $0x44] sm:$0xf0]  ;;  %v541_v42 = vor.u32 %v654_v34, %v538_v35 }
   0xb   :  { %231 = vmatpush.bf16.msra.mxu0 %v489_v24  ;;  %v636_v43 = vld [vmem:[%s1028_s1 + $0x34] sm:$0xf]  ;;  %v466_v44 = vld [vmem:[%s1028_s1 + $0x38] sm:$0xf0]  ;;  %v545_v46 = vor.u32 %v657_v38, %v544_v37  ;;  %v536_v48 = vld [vmem:[%s1028_s1 + $0xc0] sm:$0xf]  ;;  %v473_v50 = vor.u32 %v639_v41, %v472_v40 }
   0xc   :  { %258 = vmatpush.bf16.msra.mxu2 %v485_v25  ;;  %v652_v45 = vld [vmem:[%s1028_s1 + $0xb4] sm:$0xf]  ;;  %v530_v47 = vld [vmem:[%s1028_s1 + $0xb8] sm:$0xf0]  ;;  %v655_v49 = vld [vmem:[%s1028_s1 + $0xc4] sm:$0xf0]  ;;  %v469_v51 = vor.u32 %v636_v43, %v466_v44 }
   0xd   :  { %271 = vmatpush.bf16.msra.mxu3 %v549_v29  ;;  %244 = vmatpush.bf16.msra.mxu1 %v553_v31  ;;  %v464_v52 = vld [vmem:[%s1028_s1 + $0x30] sm:$0xf]  ;;  %v637_v53 = vld [vmem:[%s1028_s1 + $0x34] sm:$0xf0]  ;;  %v533_v54 = vor.u32 %v652_v45, %v530_v47  ;;  %v634_v55 = vld [vmem:[%s1028_s1 + $0x24] sm:$0xf]  ;;  %v537_v58 = vor.u32 %v655_v49, %v536_v48 }
   0xe   :  { %v458_v56 = vld [vmem:[%s1028_s1 + $0x28] sm:$0xf0]  ;;  %v650_v57 = vld [vmem:[%s1028_s1 + $0xa4] sm:$0xf]  ;;  %v528_v60 = vld [vmem:[%s1028_s1 + $0xb0] sm:$0xf]  ;;  %v465_v62 = vor.u32 %v637_v53, %v464_v52 }
   0xf   :  { %232 = vmatpush.bf16.msra.mxu0 %v481_v36  ;;  %v522_v59 = vld [vmem:[%s1028_s1 + $0xa8] sm:$0xf0]  ;;  %v653_v61 = vld [vmem:[%s1028_s1 + $0xb4] sm:$0xf0]  ;;  %v25_v63 = vld [vmem:[%s1029_s0] sm:$0x3]  ;;  %v461_v0 = vor.u32 %v634_v55, %v458_v56 }
  0x10   :  { %259 = vmatpush.bf16.msra.mxu2 %v477_v39  ;;  %v456_v1 = vld [vmem:[%s1028_s1 + $0x20] sm:$0xf]  ;;  %v635_v2 = vld [vmem:[%s1028_s1 + $0x24] sm:$0xf0]  ;;  %65 = vst [vmem:[#allocation1] ss:$9 sm:$0xff] %v25_v63  ;;  %v525_v3 = vor.u32 %v650_v57, %v522_v59  ;;  %v529_v7 = vor.u32 %v653_v61, %v528_v60 }
  0x11   :  { %272 = vmatpush.bf16.msra.mxu3 %v541_v42  ;;  %245 = vmatpush.bf16.msra.mxu1 %v545_v46  ;;  %v632_v4 = vld [vmem:[%s1028_s1 + $0x14] sm:$0xf]  ;;  %v450_v5 = vld [vmem:[%s1028_s1 + $0x18] sm:$0xf0]  ;;  %v520_v9 = vld [vmem:[%s1028_s1 + $0xa0] sm:$0xf]  ;;  %v457_v11 = vor.u32 %v635_v2, %v456_v1 }
  0x12   :  { %v648_v6 = vld [vmem:[%s1028_s1 + $0x94] sm:$0xf]  ;;  %v514_v8 = vld [vmem:[%s1028_s1 + $0x98] sm:$0xf0]  ;;  %v651_v10 = vld [vmem:[%s1028_s1 + $0xa4] sm:$0xf0]  ;;  %v453_v12 = vor.u32 %v632_v4, %v450_v5 }
  0x13   :  { %233 = vmatpush.bf16.msra.mxu0 %v473_v50  ;;  %v448_v13 = vld [vmem:[%s1028_s1 + $0x10] sm:$0xf]  ;;  %v633_v14 = vld [vmem:[%s1028_s1 + $0x14] sm:$0xf0]  ;;  %v517_v15 = vor.u32 %v648_v6, %v514_v8  ;;  %v630_v16 = vld [vmem:[%s1028_s1 + $0x4] sm:$0xf]  ;;  %v521_v19 = vor.u32 %v651_v10, %v520_v9 }
  0x14   :  { %260 = vmatpush.bf16.msra.mxu2 %v469_v51  ;;  %v442_v17 = vld [vmem:[%s1028_s1 + $0x8] sm:$0xf0]  ;;  %v646_v18 = vld [vmem:[%s1028_s1 + $0x84] sm:$0xf]  ;;  %v512_v21 = vld [vmem:[%s1028_s1 + $0x90] sm:$0xf]  ;;  %v449_v23 = vor.u32 %v633_v14, %v448_v13 }
  0x15   :  { %273 = vmatpush.bf16.msra.mxu3 %v533_v54  ;;  %246 = vmatpush.bf16.msra.mxu1 %v537_v58  ;;  %v506_v20 = vld [vmem:[%s1028_s1 + $0x88] sm:$0xf0]  ;;  %v649_v22 = vld [vmem:[%s1028_s1 + $0x94] sm:$0xf0]  ;;  %v445_v24 = vor.u32 %v630_v16, %v442_v17  ;;  %v440_v25 = vld [vmem:[%s1028_s1] sm:$0xf] }
  0x16   :  { %v631_v26 = vld [vmem:[%s1028_s1 + $0x4] sm:$0xf0]  ;;  %v509_v27 = vor.u32 %v646_v18, %v506_v20  ;;  %v513_v28 = vor.u32 %v649_v22, %v512_v21  ;;  %v624_v29 = vld [vmem:[%s1030_s4 + $0x70] sm:$0xf]  ;;  %v677_v30 = vld [vmem:[%s1030_s4 + $0x74] sm:$0xf0] }
  0x17   :  { %234 = vmatpush.bf16.msra.mxu0 %v465_v62  ;;  %v504_v31 = vld [vmem:[%s1028_s1 + $0x80] sm:$0xf]  ;;  %v647_v32 = vld [vmem:[%s1028_s1 + $0x84] sm:$0xf0]  ;;  %v441_v33 = vor.u32 %v631_v26, %v440_v25  ;;  %v676_v34 = vld [vmem:[%s1030_s4 + $0x74] sm:$0xf]  ;;  %v625_v37 = vor.u32 %v677_v30, %v624_v29 }
  0x18   :  { %261 = vmatpush.bf16.msra.mxu2 %v461_v0  ;;  %v626_v35 = vld [vmem:[%s1030_s4 + $0x78] sm:$0xf0]  ;;  %v66_v36 = vld [vmem:[#allocation1] sm:$0xff]  ;;  %v67_v38 = vld [vmem:[#allocation1 + $0x9] sm:$0xff]  ;;  %v505_v39 = vor.u32 %v647_v32, %v504_v31 }
  0x19   :  { %274 = vmatpush.bf16.msra.mxu3 %v525_v3  ;;  %247 = vmatpush.bf16.msra.mxu1 %v529_v7  ;;  %v616_v40 = vld [vmem:[%s1030_s4 + $0x60] sm:$0xf]  ;;  %v675_v41 = vld [vmem:[%s1030_s4 + $0x64] sm:$0xf0]  ;;  %v629_v42 = vor.u32 %v676_v34, %v626_v35  ;;  %v674_v43 = vld [vmem:[%s1030_s4 + $0x64] sm:$0xf] }
  0x1a   :  { %v618_v44 = vld [vmem:[%s1030_s4 + $0x68] sm:$0xf0]  ;;  %v617_v45 = vor.u32 %v675_v41, %v616_v40  ;;  %v608_v46 = vld [vmem:[%s1030_s4 + $0x50] sm:$0xf]  ;;  %v673_v47 = vld [vmem:[%s1030_s4 + $0x54] sm:$0xf0] }
  0x1b   :  { %235 = vmatpush.bf16.msra.mxu0 %v457_v11  ;;  %v621_v48 = vor.u32 %v674_v43, %v618_v44  ;;  %v672_v49 = vld [vmem:[%s1030_s4 + $0x54] sm:$0xf]  ;;  %v610_v50 = vld [vmem:[%s1030_s4 + $0x58] sm:$0xf0]  ;;  %v609_v51 = vor.u32 %v673_v47, %v608_v46  ;;  %v600_v53 = vld [vmem:[%s1030_s4 + $0x40] sm:$0xf] }
  0x1c   :  { %262 = vmatpush.bf16.msra.mxu2 %v453_v12  ;;  %v613_v52 = vor.u32 %v672_v49, %v610_v50  ;;  %v671_v54 = vld [vmem:[%s1030_s4 + $0x44] sm:$0xf0]  ;;  %v670_v55 = vld [vmem:[%s1030_s4 + $0x44] sm:$0xf]  ;;  %v602_v57 = vld [vmem:[%s1030_s4 + $0x48] sm:$0xf0] }
  0x1d   :  { %275 = vmatpush.bf16.msra.mxu3 %v517_v15  ;;  %248 = vmatpush.bf16.msra.mxu1 %v521_v19  ;;  %v601_v56 = vor.u32 %v671_v54, %v600_v53  ;;  %v605_v58 = vor.u32 %v670_v55, %v602_v57  ;;  %v592_v59 = vld [vmem:[%s1030_s4 + $0x30] sm:$0xf]  ;;  %v669_v60 = vld [vmem:[%s1030_s4 + $0x34] sm:$0xf0]  ;;  %v668_v61 = vld [vmem:[%s1030_s4 + $0x34] sm:$0xf] }
  0x1e   :  { %v593_v62 = vor.u32 %v669_v60, %v592_v59  ;;  %v594_v63 = vld [vmem:[%s1030_s4 + $0x38] sm:$0xf0]  ;;  %v584_v1 = vld [vmem:[%s1030_s4 + $0x20] sm:$0xf]  ;;  %v667_v2 = vld [vmem:[%s1030_s4 + $0x24] sm:$0xf0] }
  0x1f   :  { %236 = vmatpush.bf16.msra.mxu0 %v449_v23  ;;  %v597_v0 = vor.u32 %v668_v61, %v594_v63  ;;  %v585_v3 = vor.u32 %v667_v2, %v584_v1  ;;  %v666_v4 = vld [vmem:[%s1030_s4 + $0x24] sm:$0xf]  ;;  %v586_v5 = vld [vmem:[%s1030_s4 + $0x28] sm:$0xf0]  ;;  %v576_v7 = vld [vmem:[%s1030_s4 + $0x10] sm:$0xf] }
  0x20   :  { %263 = vmatpush.bf16.msra.mxu2 %v445_v24  ;;  %v589_v6 = vor.u32 %v666_v4, %v586_v5  ;;  %v665_v8 = vld [vmem:[%s1030_s4 + $0x14] sm:$0xf0]  ;;  %v664_v9 = vld [vmem:[%s1030_s4 + $0x14] sm:$0xf]  ;;  %v578_v11 = vld [vmem:[%s1030_s4 + $0x18] sm:$0xf0] }
  0x21   :  { %276 = vmatpush.bf16.msra.mxu3 %v509_v27  ;;  %249 = vmatpush.bf16.msra.mxu1 %v513_v28  ;;  %v577_v10 = vor.u32 %v665_v8, %v576_v7  ;;  %v581_v12 = vor.u32 %v664_v9, %v578_v11  ;;  %v568_v13 = vld [vmem:[%s1030_s4] sm:$0xf]  ;;  %v663_v14 = vld [vmem:[%s1030_s4 + $0x4] sm:$0xf0]  ;;  %v662_v15 = vld [vmem:[%s1030_s4 + $0x4] sm:$0xf] }
  0x22   :  { %v569_v16 = vor.u32 %v663_v14, %v568_v13  ;;  %v570_v17 = vld [vmem:[%s1030_s4 + $0x8] sm:$0xf0]  ;;  %v58_v19 = vld [vmem:[%s1031_s2] sm:$0x3] }
  0x23   :  { %264 = vmatmul.bf16.vlgmr.msra.gmra.mxu2 %v66_v36  ;;  %237 = vmatpush.bf16.msra.mxu0 %v441_v33  ;;  %v573_v18 = vor.u32 %v662_v15, %v570_v17  ;;  %v60_v20 = vperm.slane %v58_v19, 0  ;;  %v61_v21 = vperm.slane %v58_v19, 1  ;;  %v305_v43 = vld [vmem:[%s1034_s5] sm:$0x3] }
  0x24   :  { %277 = vmatmul.bf16.vlgmr.msra.gmra.mxu3 %v67_v38  ;;  %v308_v44 = vperm.slane %v305_v43, 1 }
  0x25   :  { %250 = vmatpush.bf16.msra.mxu1 %v505_v39 }
  0x26   :  { %238 = vmatmul.bf16.vlgmr.msra.gmra.mxu0 %v66_v36 }
  0x27   :  { %391 = vmatpush.bf16.msrb.mxu0 %v625_v37 }
  0x28   :  { %251 = vmatmul.bf16.vlgmr.msra.gmra.mxu1 %v67_v38  ;;  %v282_v38 = vld [vmem:[%s1033_s3] sm:$0x3] }
  0x29   :  { %404 = vmatpush.bf16.msrb.mxu1 %v629_v42 }
  0x2b   :  { %392 = vmatpush.bf16.msrb.mxu0 %v617_v45  ;;  %v307_v45 = vperm.slane %v305_v43, 0 }
  0x2d   :  { %405 = vmatpush.bf16.msrb.mxu1 %v621_v48 }
  0x2f   :  { %393 = vmatpush.bf16.msrb.mxu0 %v609_v51 }
  0x31   :  { %406 = vmatpush.bf16.msrb.mxu1 %v613_v52 }
  0x33   :  { %394 = vmatpush.bf16.msrb.mxu0 %v601_v56 }
  0x35   :  { %407 = vmatpush.bf16.msrb.mxu1 %v605_v58 }
  0x37   :  { %395 = vmatpush.bf16.msrb.mxu0 %v593_v62 }
  0x39   :  { %408 = vmatpush.bf16.msrb.mxu1 %v597_v0 }
  0x3b   :  { %396 = vmatpush.bf16.msrb.mxu0 %v585_v3 }
  0x3d   :  { %409 = vmatpush.bf16.msrb.mxu1 %v589_v6 }
  0x3f   :  { %397 = vmatpush.bf16.msrb.mxu0 %v577_v10 }
  0x41   :  { %410 = vmatpush.bf16.msrb.mxu1 %v581_v12 }
  0x43   :  { %398 = vmatpush.bf16.msrb.mxu0 %v569_v16 }
  0x45   :  { %411 = vmatpush.bf16.msrb.mxu1 %v573_v18 }
  0xa3   :  { %v239_v22 = vpop.f32.mrf.mxu0 }
  0xa4   :  { %v240_v23 = vadd.f32 %v239_v22, %v60_v20 }
  0xa5   :  { %v252_v24 = vpop.f32.mrf.mxu1 }
  0xa6   :  { %v265_v25 = vpop.f32.mrf.mxu2  ;;  %v253_v29 = vadd.f32 %v252_v24, %v240_v23 }
  0xa7   :  { %v266_v26 = vadd.f32 %v265_v25, %v61_v21  ;;  %v278_v27 = vpop.f32.mrf.mxu3 }
  0xa9   :  { %v279_v28 = vadd.f32 %v278_v27, %v266_v26 }
  0xab   :  { %v283_v30 = vmul.f32 0.5, %v279_v28  ;;  %v419_v31 = vrot.slane %v279_v28, 6  ;;  %v241_v32 = vpop.f32.mrf.mxu0 }
  0xad   :  { %v284_v33 = vmul.f32 1.442695, %v283_v30  ;;  %v421_v34 = vsel %vm420_vm0, %v253_v29, %v419_v31  ;;  %v254_v35 = vpop.f32.mrf.mxu1 }
  0xae   :  { %423 = vst [vmem:[%s1032_s6] sm:$0xf] %v421_v34  ;;  %v267_v36 = vpop.f32.mrf.mxu2 }
  0xaf   :  { %678 = vpow2.f32 %v284_v33  ;;  %v280_v37 = vpop.f32.mrf.mxu3 }
  0xb5   :  { %v679_v39 = vpop.eup %678 }
  0xb6   :  { %v286_v40 = vmul.f32 %v679_v39, %v282_v38 }
  0xb8   :  { %v287_v41 = vadd.f32 %v286_v40, %v253_v29 }
  0xba   :  { %v288_v42 = vpack.c.bf16 %v287_v41, %v287_v41 }
  0xbc   :  { %399 = vmatmul.bf16.vlgmr.msrb.gmra.mxu0 %v288_v42  ;;  %412 = vmatmul.bf16.vlgmr.msrb.gmra.mxu1 %v288_v42 }
 0x139   :  { %v400_v46 = vpop.f32.mrf.mxu0  ;;  %v413_v47 = vpop.f32.mrf.mxu1 }
 0x13a   :  { %v414_v48 = vadd.f32 %v413_v47, %v308_v44  ;;  %v401_v49 = vadd.f32 %v400_v46, %v307_v45 }
 0x13c   :  { %v426_v50 = vrot.slane %v414_v48, 6 }
 0x13e   :  { %v427_v51 = vsel %vm420_vm0, %v401_v49, %v426_v50 }
 0x13f   :  { %429 = vst [vmem:[%s1035_s7] sm:$0xf] %v427_v51 }
 0x141   :  { %v402_v52 = vpop.f32.mrf.mxu0  ;;  %v415_v53 = vpop.f32.mrf.mxu1 }

// kernel: vae_forward.8
= control target key start
LH: loop header
LB: loop body
LE: loop exit
PB: predicated region body
PF: predicated region fallthrough
CT: control target
= control target key end

     0   :  { %s565_s12 = smov 0   ;;  %s567_s13 = smov 0   ;;  %s613_s0 = inlined_call_operand.vmem [shape: bf16[4,8,64], index: 0, kind: input, shape index: {}]   ;;  %s614_s1 = inlined_call_operand.vmem [shape: bf16[4,64,128], index: 1, kind: input, shape index: {}]   ;;  %s615_s2 = inlined_call_operand.vmem [shape: f32[4,8,1], index: 2, kind: input, shape index: {}]   ;;  %s616_s3 = inlined_call_operand.vmem [shape: f32[4,8,128], index: 3, kind: output, shape index: {}]  }
   0x1   :  { %s569_s14 = smov 0  }
   0x2 LB: > { %s32_s15 = sadd.s32 1, %s538_s13  ;;  %p462_p0 = scmp.ge.s32.totalorder %s542_s14, 1  ;;  %s542_s14 = sphi %s569_s14, %s13_s14   ;;  %s538_s13 = sphi %s567_s13, %s618_s13   ;;  %s534_s12 = sphi %s565_s12, %s617_s12  }
   0x3   : > { %p34_p1 = scmp.ge.s32.totalorder %s32_s15, 4  ;;  %p193_p2 = scmp.lt.s32.totalorder %s542_s14, 5 }
   0x5   : > { %s620_s15 = smov (%p34_p1, %s32_s15), 0  ;;  %p194_p3 = pnand %p462_p0, %p193_p2 }
   0x6   : > { %p237_p4 = scmp.lt.s32.totalorder (!%p194_p3), %s534_s12, 3 }
   0x7   : > { %197 = sbr.rel (%p194_p3) target bundleno = 181 (0xb5), region = 32 }
   0xc   : > { %v544_v0 = vmov 0   ;;  %s622_s12 = smov (!%p237_p4, %s534_s12), 3  ;;  %vm308_vm0 = vcmask 523264  }
   0xd   : > { %517 = vset.pattern.permute.xlu0 %v544_v0  ;;  %s487_s16 = sshll.u32 %s622_s12, 5  ;;  %s466_s20 = sshll.u32 %s622_s12, 3 }
   0xe   : > { %s255_s19 = scalar_lea.vmem %s614_s1, %s487_s16  ;;  %s260_s23 = scalar_lea.vmem %s615_s2, %s466_s20 }
   0xf   : > { %v491_v1 = vld [vmem:[%s255_s19 + $0x18] sm:$0xff]  ;;  %v490_v2 = vld [vmem:[%s255_s19 + $0x10] sm:$0xff]  ;;  %v331_v3 = vld [vmem:[%s260_s23] sm:$0xff]  ;;  %s463_s24 = sshll.u32 %s622_s12, 2  ;;  %s267_s30 = scalar_lea.vmem %s616_s3, %s466_s20 }
  0x10   : > { %316 = vmatpush.bf16.msra.mxu0 %v491_v1  ;;  %334 = vperm.xlu0 %517, %v331_v3   ;;  %v489_v4 = vld [vmem:[%s255_s19 + $0x8] sm:$0xff]  ;;  %v488_v5 = vld [vmem:[%s255_s19] sm:$0xff]  ;;  %s243_s27 = scalar_lea.vmem %s613_s0, %s463_s24 }
  0x11   : > { %v275_v6 = vld [vmem:[%s243_s27] sm:$0xf] }
  0x14   : > { %317 = vmatpush.bf16.msra.mxu0 %v490_v2 }
  0x18   : > { %318 = vmatpush.bf16.msra.mxu0 %v489_v4 }
  0x1c   : > { %319 = vmatpush.bf16.msra.mxu0 %v488_v5 }
  0x1f   : > { %484 = vmatmul.msk.bf16.vlgmr.msra.gmra.mxu0 %vm308_vm0, %v275_v6 }
  0x82   : > { %v335_v7 = vpop.permute.xlu0 %334 }
  0x9c   : > { %v321_v8 = vpop.f32.mrf.mxu0 }
  0x9d   : > { %v337_v9 = vadd.f32 %v335_v7, %v321_v8 }
  0x9f   : > { %v339_v10 = vmul.f32 0.044715, %v337_v9  ;;  %v338_v17 = vmul.f32 0.5, %v337_v9 }
  0xa1   : > { %v340_v11 = vmul.f32 %v339_v10, %v337_v9 }
  0xa3   : > { %v341_v12 = vmul.f32 %v340_v11, %v337_v9 }
  0xa4   : > { %v323_v13 = vpop.f32.mrf.mxu0 }
  0xa5   : > { %v342_v14 = vadd.f32 %v341_v12, %v337_v9 }
  0xa7   : > { %v343_v15 = vmul.f32 0.7978846, %v342_v14 }
  0xa9   : > { %518 = vtanh.f32 %v343_v15 }
  0xaf   : > { %v519_v16 = vpop.eup %518 }
  0xb0   : > { %v345_v18 = vadd.f32 1.0, %v519_v16 }
  0xb2   : > { %v346_v19 = vmul.f32 %v345_v18, %v338_v17 }
  0xb4   : > { %347 = vst [vmem:[%s267_s30] sm:$0xff] %v346_v19 }
  0xb5 PF: > { %s13_s14 = sadd.s32 1, %s542_s14   ;;  %s617_s12 = smov %s538_s13 }
  0xb6   : > { %p10_p5 = scmp.ge.s32.totalorder %s13_s14, 6   ;;  %s618_s13 = smov %s620_s15 }
  0xb8   :  { %12 = sbr.rel (!%p10_p5) target bundleno = 2 (0x2), region = 76 }

// kernel: vae_forward.9
= control target key start
LH: loop header
LB: loop body
LE: loop exit
PB: predicated region body
PF: predicated region fallthrough
CT: control target
= control target key end

     0   :  { %s563_s12 = smov 0   ;;  %s565_s13 = smov 0   ;;  %s611_s0 = inlined_call_operand.vmem [shape: bf16[4,8,32], index: 0, kind: input, shape index: {}]   ;;  %s612_s1 = inlined_call_operand.vmem [shape: bf16[4,32,128], index: 1, kind: input, shape index: {}]   ;;  %s613_s2 = inlined_call_operand.vmem [shape: f32[4,8,1], index: 2, kind: input, shape index: {}]   ;;  %s614_s3 = inlined_call_operand.vmem [shape: f32[4,8,128], index: 3, kind: output, shape index: {}]  }
   0x1   :  { %s567_s14 = smov 0  }
   0x2 LB: > { %s32_s15 = sadd.s32 1, %s536_s13  ;;  %p465_p0 = scmp.ge.s32.totalorder %s540_s14, 1  ;;  %s540_s14 = sphi %s567_s14, %s13_s14   ;;  %s536_s13 = sphi %s565_s13, %s616_s13   ;;  %s532_s12 = sphi %s563_s12, %s615_s12  }
   0x3   : > { %p34_p1 = scmp.ge.s32.totalorder %s32_s15, 4  ;;  %p193_p2 = scmp.lt.s32.totalorder %s540_s14, 5 }
   0x5   : > { %s618_s15 = smov (%p34_p1, %s32_s15), 0  ;;  %p194_p3 = pnand %p465_p0, %p193_p2 }
   0x6   : > { %p237_p4 = scmp.lt.s32.totalorder (!%p194_p3), %s532_s12, 3 }
   0x7   : > { %197 = sbr.rel (%p194_p3) target bundleno = 201 (0xc9), region = 32 }
   0xc   : > { %v542_v0 = vmov 0   ;;  %s620_s12 = smov (!%p237_p4, %s532_s12), 3  ;;  %vm292_vm0 = vcmask 261120  }
   0xd   : > { %511 = vset.pattern.permute.xlu0 %v542_v0  ;;  %s483_s16 = sshll.u32 %s620_s12, 4  ;;  %s466_s20 = sshll.u32 %s620_s12, 2 }
   0xe   : > { %s255_s19 = scalar_lea.vmem %s612_s1, %s483_s16  ;;  %s469_s21 = sshll.u32 %s620_s12, 3 }
   0xf   : > { %v485_v1 = vld [vmem:[%s255_s19 + $0x8] sm:$0xff]  ;;  %s260_s24 = scalar_lea.vmem %s613_s2, %s469_s21  ;;  %v484_v2 = vld [vmem:[%s255_s19] sm:$0xff]  ;;  %s243_s27 = scalar_lea.vmem %s611_s0, %s466_s20 }
  0x10   : > { %302 = vmatpush.bf16.msra.mxu0 %v485_v1  ;;  %v315_v3 = vld [vmem:[%s260_s24] sm:$0xff]  ;;  %s267_s30 = scalar_lea.vmem %s614_s3, %s469_s21 }
  0x11   : > { %318 = vperm.xlu0 %511, %v315_v3   ;;  %v275_v4 = vld [vmem:[%s243_s27] sm:$0xf] }
  0x14   : > { %303 = vmatpush.bf16.msra.mxu0 %v484_v2 }
  0x17   : > { %479 = vmatmul.msk.bf16.vlgmr.msra.gmra.mxu0 %vm292_vm0, %v275_v4 }
  0x83   : > { %v319_v5 = vpop.permute.xlu0 %318 }
  0x94   : > { %v305_v6 = vpop.f32.mrf.mxu0 }
  0x95   : > { %v321_v7 = vadd.f32 %v319_v5, %v305_v6 }
  0x97   : > { %v323_v8 = vmul.f32 0.044715, %v321_v7  ;;  %v322_v15 = vmul.f32 0.5, %v321_v7 }
  0x99   : > { %v324_v9 = vmul.f32 %v323_v8, %v321_v7 }
  0x9b   : > { %v325_v10 = vmul.f32 %v324_v9, %v321_v7 }
  0x9c   : > { %v307_v11 = vpop.f32.mrf.mxu0 }
  0x9d   : > { %v326_v12 = vadd.f32 %v325_v10, %v321_v7 }
  0x9f   : > { %v327_v13 = vmul.f32 0.7978846, %v326_v12 }
  0xa1   : > { %512 = vtanh.f32 %v327_v13 }
  0xa7   : > { %v513_v14 = vpop.eup %512 }
  0xa8   : > { %v329_v16 = vadd.f32 1.0, %v513_v14 }
  0xaa   : > { %v330_v17 = vmul.f32 %v329_v16, %v322_v15 }
  0xac   : > { %v480_v18 = vmul.f32 -1.442695, %v330_v17 }
  0xae   : > { %514 = vpow2.f32 %v480_v18 }
  0xb4   : > { %v515_v19 = vpop.eup %514 }
  0xb5   : > { %v334_v20 = vadd.f32 1.0, %v515_v19 }
  0xb7   : > { %516 = vrcp.f32 %v334_v20  ;;  %v346_v24 = vand.u32 2147483648, %v334_v20  ;;  %v344_v26 = vand.u32 2147483647, %v334_v20  ;;  %vm340_vm2 = vweird.f32 %v334_v20 }
  0xb9   : > { %v347_v28 = vor.u32 1.1754944e-38, %v346_v24  ;;  %vm345_vm4 = vcmp.eq.f32.partialorder %v344_v26, 8.507059e+37 }
  0xbd   : > { %v517_v21 = vpop.eup %516 }
  0xbe   : > { %v336_v22 = vmul.f32 %v517_v21, %v334_v20  ;;  %vm341_vm1 = vweird.f32 %v517_v21 }
  0xbf   : > { %vm342_vm3 = vmor %vm340_vm2, %vm341_vm1 }
  0xc0   : > { %v337_v23 = vsub.f32 1.0, %v336_v22 }
  0xc2   : > { %v338_v25 = vmul.f32 %v517_v21, %v337_v23 }
  0xc4   : > { %v339_v27 = vadd.f32 %v517_v21, %v338_v25 }
  0xc6   : > { %v343_v29 = vsel %vm342_vm3, %v517_v21, %v339_v27 }
  0xc7   : > { %v348_v30 = vsel %vm345_vm4, %v347_v28, %v343_v29 }
  0xc8   : > { %350 = vst [vmem:[%s267_s30] sm:$0xff] %v348_v30 }
  0xc9 PF: > { %s13_s14 = sadd.s32 1, %s540_s14   ;;  %s615_s12 = smov %s536_s13 }
  0xca   : > { %p10_p5 = scmp.ge.s32.totalorder %s13_s14, 6   ;;  %s616_s13 = smov %s618_s15 }
  0xcc   :  { %12 = sbr.rel (!%p10_p5) target bundleno = 2 (0x2), region = 76 }

</bundles_post_ra>
